<compile_context>
chip_gen: v6e
topology: v6e:2x2x1
jax: 0.10.0
libtpu: 0.0.40
codegen_flags: <defaults>
</compile_context>

<pallas_src>
import math
import jax
import jax.numpy as jnp
from jax.experimental import pallas as pl
from jax.experimental.pallas import tpu as pltpu

# ----------------------------- model config ---------------------------------
B = 2            # batch
S = 8            # sequence length
S_PAD = 128      # lane-dense padded mask width
H = 128          # hidden size      (real DistilBERT: 768)
N_HEADS = 2      # attention heads  (real: 12)
DH = H // N_HEADS
FFN = 256        # feed-forward dim (real: 3072)
N_LAYERS = 2     # transformer layers (real: 6)
VOCAB = 64
EPS = 1e-12
SCALE = 1.0 / math.sqrt(DH)
NEG_INF = -1e9

N_ROLE, N_FUNCTION, N_LEVEL = 7, 5, 6
N_OUT = N_ROLE + N_FUNCTION + N_LEVEL   # 18
OUT_PAD = 128                           # lane-dense padded logit width


# ----------------------------- kernel helpers --------------------------------
def _layernorm(x, gamma, beta):
    # Single pass over x: mean and mean-of-squares (independent cross-lane reduces)
    # instead of the serial mean -> centered-variance pair.
    mu = jnp.mean(x, axis=-1, keepdims=True)
    ms = jnp.mean(x * x, axis=-1, keepdims=True)
    var = jnp.maximum(ms - mu * mu, 0.0)
    return (x - mu) * jax.lax.rsqrt(var + EPS) * gamma + beta


# ----------------------------- fused encoder kernel ---------------------------
def encoder_kernel(emb_ref, mask_ref, eg_ref, eb_ref,
                   wqkv_ref, bqkv_ref, wo_ref, bo_ref, g1_ref, be1_ref,
                   w1_ref, c1_ref, w2_ref, c2_ref, g2_ref, be2_ref,
                   pool_ref, h_scratch):
    """grid=(N_LAYERS,): step l applies encoder layer l to the VMEM-resident hidden
    state; step 0 additionally runs the embedding LayerNorm; the last step writes the
    [CLS] pooler rows (strided sublane read of the scratch)."""
    layer = pl.program_id(0)

    # --- step 0: embedding LayerNorm -> resident hidden state -------------
    @pl.when(layer == 0)
    def _():
        h_scratch[...] = _layernorm(emb_ref[...], eg_ref[...], eb_ref[...])

    x = h_scratch[...]                       # (B*S, H) f32
    x_bf = x.astype(jnp.bfloat16)

    # --- fused QKV projection over the flattened batch --------------------
    qkv = jnp.dot(x_bf, wqkv_ref[0],
                  preferred_element_type=jnp.float32) + bqkv_ref[0]   # (B*S, 3H) f32

    # (B*S, H) -> (B, S, H): free leading-dim split (sublane tiles preserved)
    q3 = qkv[:, 0:H].reshape(B, S, H)
    k3 = qkv[:, H:2 * H].reshape(B, S, H)
    v3 = qkv[:, 2 * H:3 * H].reshape(B, S, H)

    # lane-dense (B, 1, 128) mask; only the first S key columns are used
    mask3 = mask_ref[...][:, :, :S]          # (B, 1, S) additive bias, f32

    # --- multi-head self-attention, batched over B per head ---------------
    # TODO(synk): for real DistilBERT (12 heads) batch the score/context einsums over
    # (B*heads) as well instead of this tiny static head unroll.
    ctxs = []
    for hh in range(N_HEADS):                # static unroll (2 heads)
        cols = slice(hh * DH, (hh + 1) * DH)
        qh = q3[:, :, cols].astype(jnp.bfloat16)
        kh = k3[:, :, cols].astype(jnp.bfloat16)
        vh = v3[:, :, cols].astype(jnp.bfloat16)
        s = jnp.einsum('bqd,bkd->bqk', qh, kh,
                       preferred_element_type=jnp.float32) * SCALE   # (B, S, S) f32
        s = s + mask3
        s = s - jnp.max(s, axis=-1, keepdims=True)
        p = jnp.exp(s)
        p = p * pl.reciprocal(jnp.sum(p, axis=-1, keepdims=True), approx=True)
        ctxs.append(jnp.einsum('bqk,bkd->bqd', p.astype(jnp.bfloat16), vh,
                               preferred_element_type=jnp.float32))  # (B, S, DH)

    # lane-concat the per-head contexts (adjacent 64-lane halves of one 128-lane
    # tile), merge the leading dims (free), then ONE output-projection matmul.
    ctx_full = jnp.concatenate(ctxs, axis=-1).reshape(B * S, H)       # (B*S, H) f32
    attn = jnp.dot(ctx_full.astype(jnp.bfloat16), wo_ref[0],
                   preferred_element_type=jnp.float32) + bo_ref[0]    # (B*S, H)

    x1 = _layernorm(x + attn, g1_ref[0], be1_ref[0])

    # --- feed-forward over the flattened batch ----------------------------
    ff = jnp.dot(x1.astype(jnp.bfloat16), w1_ref[0],
                 preferred_element_type=jnp.float32) + c1_ref[0]      # (B*S, FFN)
    # TODO(synk): HF DistilBERT uses exact (erf) GELU; tanh approximation kept here.
    ff = jax.nn.gelu(ff, approximate=True)
    ff = jnp.dot(ff.astype(jnp.bfloat16), w2_ref[0],
                 preferred_element_type=jnp.float32) + c2_ref[0]      # (B*S, H)

    y = _layernorm(x1 + ff, g2_ref[0], be2_ref[0])
    h_scratch[...] = y

    # --- last step: [CLS] pooling via strided sublane read ----------------
    @pl.when(layer == pl.num_programs(0) - 1)
    def _():
        pool_ref[...] = h_scratch[pl.ds(0, B, stride=S), :]           # rows 0, S, ...


# ----------------------------- heads kernel -----------------------------------
def heads_kernel(pool_ref, wpre_ref, bpre_ref, wcls_ref, bcls_ref, out_ref):
    """Fused three-head classifier on the [CLS] pooler: Linear -> ReLU -> (Dropout
    is identity at inference) -> block-diagonal classifier with a lane-dense store."""
    pre = jnp.dot(pool_ref[...].astype(jnp.bfloat16), wpre_ref[...],
                  preferred_element_type=jnp.float32) + bpre_ref[...]   # (B, 3H)
    pre = jnp.maximum(pre, 0.0)              # ReLU; Dropout(0.3) is identity in eval
    out_ref[...] = jnp.dot(pre.astype(jnp.bfloat16), wcls_ref[...],
                           preferred_element_type=jnp.float32) + bcls_ref[...]


# ----------------------------- pallas_call wrappers ----------------------------
def _encoder_cost():
    m = B * S
    flops_layer = (2 * m * H * 3 * H                     # qkv
                   + 2 * B * N_HEADS * S * S * DH * 2    # scores + ctx
                   + 2 * m * H * H                       # output projection
                   + 2 * m * H * FFN + 2 * m * FFN * H)  # ffn
    trans_layer = B * N_HEADS * S * S + m * FFN + 4 * m  # exp + gelu + rsqrt/recip
    bytes_layer = (2 * (H * 3 * H + H * H + H * FFN + FFN * H)     # bf16 weights
                   + 4 * (3 * H + 4 * H + FFN))                    # f32 biases/LN
    bytes_total = (N_LAYERS * bytes_layer + 4 * m * H + 4 * B * S_PAD
                   + 4 * 2 * H + 4 * B * H)
    return (int(N_LAYERS * flops_layer), int(N_LAYERS * trans_layer), int(bytes_total))


def _fused_encoder(emb_flat, mask_bias, p):
    flops, trans, nbytes = _encoder_cost()
    grid_spec = pltpu.PrefetchScalarGridSpec(
        num_scalar_prefetch=0,
        grid=(N_LAYERS,),
        in_specs=[
            pl.BlockSpec((B * S, H), lambda l: (0, 0)),            # embeddings
            pl.BlockSpec((B, 1, S_PAD), lambda l: (0, 0, 0)),      # lane-dense mask bias
            pl.BlockSpec((1, H), lambda l: (0, 0)),                # emb LN gamma
            pl.BlockSpec((1, H), lambda l: (0, 0)),                # emb LN beta
            pl.BlockSpec((1, H, 3 * H), lambda l: (l, 0, 0)),      # wqkv (stacked)
            pl.BlockSpec((1, 1, 3 * H), lambda l: (l, 0, 0)),      # bqkv
            pl.BlockSpec((1, H, H), lambda l: (l, 0, 0)),          # wo
            pl.BlockSpec((1, 1, H), lambda l: (l, 0, 0)),          # bo
            pl.BlockSpec((1, 1, H), lambda l: (l, 0, 0)),          # ln1 gamma
            pl.BlockSpec((1, 1, H), lambda l: (l, 0, 0)),          # ln1 beta
            pl.BlockSpec((1, H, FFN), lambda l: (l, 0, 0)),        # w1
            pl.BlockSpec((1, 1, FFN), lambda l: (l, 0, 0)),        # c1
            pl.BlockSpec((1, FFN, H), lambda l: (l, 0, 0)),        # w2
            pl.BlockSpec((1, 1, H), lambda l: (l, 0, 0)),          # c2
            pl.BlockSpec((1, 1, H), lambda l: (l, 0, 0)),          # ln2 gamma
            pl.BlockSpec((1, 1, H), lambda l: (l, 0, 0)),          # ln2 beta
        ],
        out_specs=pl.BlockSpec((B, H), lambda l: (0, 0)),          # [CLS] pooler rows
        scratch_shapes=[pltpu.VMEM((B * S, H), jnp.float32)],      # resident hidden state
    )
    return pl.pallas_call(
        encoder_kernel,
        out_shape=jax.ShapeDtypeStruct((B, H), jnp.float32),
        grid_spec=grid_spec,
        compiler_params=pltpu.CompilerParams(
            dimension_semantics=("arbitrary",),
            vmem_limit_bytes=32 * 1024 * 1024),
        cost_estimate=pl.CostEstimate(flops=flops, transcendentals=trans,
                                      bytes_accessed=nbytes),
    )(emb_flat, mask_bias, p["emb_ln_g"], p["emb_ln_b"],
      p["wqkv"], p["bqkv"], p["wo"], p["bo"], p["g1"], p["be1"],
      p["w1"], p["c1"], p["w2"], p["c2"], p["g2"], p["be2"])


def _fused_heads(pooler, p):
    flops = 2 * B * H * 3 * H + 2 * B * 3 * H * OUT_PAD
    nbytes = 2 * (H * 3 * H + 3 * H * OUT_PAD) + 4 * (3 * H + OUT_PAD + 2 * B * H)
    return pl.pallas_call(
        heads_kernel,
        out_shape=jax.ShapeDtypeStruct((B, OUT_PAD), jnp.float32),
        cost_estimate=pl.CostEstimate(flops=int(flops), transcendentals=0,
                                      bytes_accessed=int(nbytes)),
    )(pooler, p["wpre"], p["bpre"], p["wcls"], p["bcls"])


# ----------------------------- parameter init --------------------------------
def _linear(key, fan_in, fan_out):
    kw, kb = jax.random.split(key)
    w = jax.random.normal(kw, (fan_in, fan_out), jnp.float32) * 0.02
    b = jax.random.normal(kb, (fan_out,), jnp.float32) * 0.02
    return w, b


def init_params(key):
    keys = jax.random.split(key, 2 + 6 * N_LAYERS + 6)
    it = iter(keys)
    p = {}
    p["tok_emb"] = jax.random.normal(next(it), (VOCAB, H), jnp.float32) * 0.02
    p["pos_emb"] = jax.random.normal(next(it), (S, H), jnp.float32) * 0.02
    p["emb_ln_g"] = jnp.ones((1, H), jnp.float32)
    p["emb_ln_b"] = jnp.zeros((1, H), jnp.float32)

    wqkv, bqkv, wo, bo, w1, c1, w2, c2 = ([] for _ in range(8))
    for _ in range(N_LAYERS):
        wq, bq_ = _linear(next(it), H, H)
        wk, bk_ = _linear(next(it), H, H)
        wv, bv_ = _linear(next(it), H, H)
        wo_, bo_ = _linear(next(it), H, H)
        w1_, c1_ = _linear(next(it), H, FFN)
        w2_, c2_ = _linear(next(it), FFN, H)
        wqkv.append(jnp.concatenate([wq, wk, wv], axis=1))           # (H, 3H)
        bqkv.append(jnp.concatenate([bq_, bk_, bv_], axis=0)[None, :])
        wo.append(wo_); bo.append(bo_[None, :])
        w1.append(w1_); c1.append(c1_[None, :])
        w2.append(w2_); c2.append(c2_[None, :])

    # matmul weights in bf16 (f32 accumulation in-kernel); biases / LN in f32
    p["wqkv"] = jnp.stack(wqkv).astype(jnp.bfloat16)   # (L, H, 3H)
    p["bqkv"] = jnp.stack(bqkv)                        # (L, 1, 3H)
    p["wo"] = jnp.stack(wo).astype(jnp.bfloat16)       # (L, H, H)
    p["bo"] = jnp.stack(bo)                            # (L, 1, H)
    p["w1"] = jnp.stack(w1).astype(jnp.bfloat16)       # (L, H, FFN)
    p["c1"] = jnp.stack(c1)                            # (L, 1, FFN)
    p["w2"] = jnp.stack(w2).astype(jnp.bfloat16)       # (L, FFN, H)
    p["c2"] = jnp.stack(c2)                            # (L, 1, H)
    p["g1"] = jnp.ones((N_LAYERS, 1, H), jnp.float32)
    p["be1"] = jnp.zeros((N_LAYERS, 1, H), jnp.float32)
    p["g2"] = jnp.ones((N_LAYERS, 1, H), jnp.float32)
    p["be2"] = jnp.zeros((N_LAYERS, 1, H), jnp.float32)

    # --- fused heads ---
    wpre_r, bpre_r = _linear(next(it), H, H)
    wpre_f, bpre_f = _linear(next(it), H, H)
    wpre_l, bpre_l = _linear(next(it), H, H)
    wcls_r, bcls_r = _linear(next(it), H, N_ROLE)
    wcls_f, bcls_f = _linear(next(it), H, N_FUNCTION)
    wcls_l, bcls_l = _linear(next(it), H, N_LEVEL)

    p["wpre"] = jnp.concatenate([wpre_r, wpre_f, wpre_l], axis=1).astype(jnp.bfloat16)  # (H, 3H)
    p["bpre"] = jnp.concatenate([bpre_r, bpre_f, bpre_l], axis=0)[None, :]              # (1, 3H)

    wcls = jnp.zeros((3 * H, OUT_PAD), jnp.float32)
    wcls = wcls.at[0:H, 0:N_ROLE].set(wcls_r)
    wcls = wcls.at[H:2 * H, N_ROLE:N_ROLE + N_FUNCTION].set(wcls_f)
    wcls = wcls.at[2 * H:3 * H, N_ROLE + N_FUNCTION:N_OUT].set(wcls_l)
    p["wcls"] = wcls.astype(jnp.bfloat16)                                               # (3H, 128)

    bcls = jnp.zeros((OUT_PAD,), jnp.float32)
    bcls = bcls.at[0:N_ROLE].set(bcls_r)
    bcls = bcls.at[N_ROLE:N_ROLE + N_FUNCTION].set(bcls_f)
    bcls = bcls.at[N_ROLE + N_FUNCTION:N_OUT].set(bcls_l)
    p["bcls"] = bcls[None, :]                                                           # (1, 128)
    return p


# ----------------------------- forward pass ----------------------------------
def distilbert_class_forward(input_ids, attention_mask, params):
    # Embedding lookup (JAX glue), flattened to (B*S, H) for the fused kernel.
    tok = jnp.take(params["tok_emb"], input_ids, axis=0)            # (B, S, H)
    pos = params["pos_emb"][None, :, :]                             # (1, S, H)
    emb = (tok + pos).reshape(B * S, H)

    # Additive attention-mask bias (0 keep / -1e9 masked), padded lane-dense to 128.
    mask_bias = (1.0 - attention_mask.astype(jnp.float32)) * NEG_INF   # (B, S)
    mask_bias = jnp.pad(mask_bias, ((0, 0), (0, S_PAD - S)),
                        constant_values=NEG_INF)[:, None, :]           # (B, 1, 128)

    pooler = _fused_encoder(emb, mask_bias, params)                 # (B, H)
    logits = _fused_heads(pooler, params)                           # (B, 128) padded

    role = logits[:, :N_ROLE]
    function = logits[:, N_ROLE:N_ROLE + N_FUNCTION]
    level = logits[:, N_ROLE + N_FUNCTION:N_OUT]
    return {"Role": role, "Function": function, "Level": level}


# ----------------------------- main -------------------------------------------
if __name__ == "__main__":
    key = jax.random.PRNGKey(0)
    k_param, k_ids = jax.random.split(key)

    params = init_params(k_param)

    input_ids = jax.random.randint(k_ids, (B, S), 0, VOCAB, dtype=jnp.int32)
    # Last two tokens of sample 1 are padding.
    attention_mask = jnp.array(
        [[1, 1, 1, 1, 1, 1, 1, 1],
         [1, 1, 1, 1, 1, 1, 0, 0]], dtype=jnp.int32)

    fwd = jax.jit(distilbert_class_forward)
    out = fwd(input_ids, attention_mask, params)
    out = jax.block_until_ready(out)

    assert out["Role"].shape == (B, N_ROLE)
    assert out["Function"].shape == (B, N_FUNCTION)
    assert out["Level"].shape == (B, N_LEVEL)
    assert all(bool(jnp.all(jnp.isfinite(v))) for v in out.values())
    print("KERNEL_OK")
</pallas_src>

<mosaic_0001>
module attributes {stable_mosaic.version = 11 : i64} {
  func.func @encoder_kernel(%arg0: i32, %arg1: memref<16x128xf32, #tpu.memory_space<vmem>>, %arg2: memref<2x1x128xf32, #tpu.memory_space<vmem>>, %arg3: memref<1x128xf32, #tpu.memory_space<vmem>>, %arg4: memref<1x128xf32, #tpu.memory_space<vmem>>, %arg5: memref<1x128x384xbf16, #tpu.memory_space<vmem>>, %arg6: memref<1x1x384xf32, #tpu.memory_space<vmem>>, %arg7: memref<1x128x128xbf16, #tpu.memory_space<vmem>>, %arg8: memref<1x1x128xf32, #tpu.memory_space<vmem>>, %arg9: memref<1x1x128xf32, #tpu.memory_space<vmem>>, %arg10: memref<1x1x128xf32, #tpu.memory_space<vmem>>, %arg11: memref<1x128x256xbf16, #tpu.memory_space<vmem>>, %arg12: memref<1x1x256xf32, #tpu.memory_space<vmem>>, %arg13: memref<1x256x128xbf16, #tpu.memory_space<vmem>>, %arg14: memref<1x1x128xf32, #tpu.memory_space<vmem>>, %arg15: memref<1x1x128xf32, #tpu.memory_space<vmem>>, %arg16: memref<1x1x128xf32, #tpu.memory_space<vmem>>, %arg17: memref<2x128xf32, #tpu.memory_space<vmem>>, %arg18: memref<16x128xf32, #tpu.memory_space<vmem>>) attributes {dimension_semantics = [#tpu.dimension_semantics<arbitrary>], iteration_bounds = array<i64: 2>, scalar_prefetch = 0 : i64, scratch_operands = 1 : i64, tpu.core_type = #tpu.core_type<tc>, window_params = [{pipeline_mode = #tpu.pipeline_mode<synchronous>, transform_indices = @transform_0, window_bounds = array<i64: 16, 128>}, {pipeline_mode = #tpu.pipeline_mode<synchronous>, transform_indices = @transform_1, window_bounds = array<i64: 2, 1, 128>}, {pipeline_mode = #tpu.pipeline_mode<synchronous>, transform_indices = @transform_2, window_bounds = array<i64: 1, 128>}, {pipeline_mode = #tpu.pipeline_mode<synchronous>, transform_indices = @transform_3, window_bounds = array<i64: 1, 128>}, {transform_indices = @transform_4, window_bounds = array<i64: 1, 128, 384>}, {transform_indices = @transform_5, window_bounds = array<i64: 1, 1, 384>}, {transform_indices = @transform_6, window_bounds = array<i64: 1, 128, 128>}, {transform_indices = @transform_7, window_bounds = array<i64: 1, 1, 128>}, {transform_indices = @transform_8, window_bounds = array<i64: 1, 1, 128>}, {transform_indices = @transform_9, window_bounds = array<i64: 1, 1, 128>}, {transform_indices = @transform_10, window_bounds = array<i64: 1, 128, 256>}, {transform_indices = @transform_11, window_bounds = array<i64: 1, 1, 256>}, {transform_indices = @transform_12, window_bounds = array<i64: 1, 256, 128>}, {transform_indices = @transform_13, window_bounds = array<i64: 1, 1, 128>}, {transform_indices = @transform_14, window_bounds = array<i64: 1, 1, 128>}, {transform_indices = @transform_15, window_bounds = array<i64: 1, 1, 128>}, {pipeline_mode = #tpu.pipeline_mode<synchronous>, transform_indices = @transform_16, window_bounds = array<i64: 2, 128>}]} {
    %c0_i32 = arith.constant 0 : i32
    %0 = arith.cmpi eq, %arg0, %c0_i32 : i32
    %1 = arith.extui %0 : i1 to i32
    %c0_i32_0 = arith.constant 0 : i32
    %2 = arith.cmpi ne, %1, %c0_i32_0 : i32
    scf.if %2 {
      %c0_73 = arith.constant 0 : index
      %c0_74 = arith.constant 0 : index
      %167 = vector.load %arg1[%c0_73, %c0_74] : memref<16x128xf32, #tpu.memory_space<vmem>>, vector<16x128xf32>
      %c0_75 = arith.constant 0 : index
      %c0_76 = arith.constant 0 : index
      %168 = vector.load %arg3[%c0_75, %c0_76] : memref<1x128xf32, #tpu.memory_space<vmem>>, vector<1x128xf32>
      %c0_77 = arith.constant 0 : index
      %c0_78 = arith.constant 0 : index
      %169 = vector.load %arg4[%c0_77, %c0_78] : memref<1x128xf32, #tpu.memory_space<vmem>>, vector<1x128xf32>
      %cst_79 = arith.constant dense<0.000000e+00> : vector<16xf32>
      %170 = vector.multi_reduction <add>, %167, %cst_79 [1] : vector<16x128xf32> to vector<16xf32>
      %171 = vector.shape_cast %170 : vector<16xf32> to vector<16x1xf32>
      %cst_80 = arith.constant 1.280000e+02 : f32
      %172 = vector.broadcast %cst_80 : f32 to vector<16x1xf32>
      %173 = arith.divf %171, %172 : vector<16x1xf32>
      %174 = arith.mulf %167, %167 : vector<16x128xf32>
      %cst_81 = arith.constant dense<0.000000e+00> : vector<16xf32>
      %175 = vector.multi_reduction <add>, %174, %cst_81 [1] : vector<16x128xf32> to vector<16xf32>
      %176 = vector.shape_cast %175 : vector<16xf32> to vector<16x1xf32>
      %cst_82 = arith.constant 1.280000e+02 : f32
      %177 = vector.broadcast %cst_82 : f32 to vector<16x1xf32>
      %178 = arith.divf %176, %177 : vector<16x1xf32>
      %179 = arith.mulf %173, %173 : vector<16x1xf32>
      %180 = arith.subf %178, %179 : vector<16x1xf32>
      %cst_83 = arith.constant 0.000000e+00 : f32
      %181 = vector.broadcast %cst_83 : f32 to vector<16x1xf32>
      %182 = arith.maximumf %180, %181 : vector<16x1xf32>
      %183 = vector.broadcast %173 : vector<16x1xf32> to vector<16x128xf32>
      %184 = arith.subf %167, %183 : vector<16x128xf32>
      %cst_84 = arith.constant 9.99999996E-13 : f32
      %185 = vector.broadcast %cst_84 : f32 to vector<16x1xf32>
      %186 = arith.addf %182, %185 : vector<16x1xf32>
      %187 = math.rsqrt %186 : vector<16x1xf32>
      %188 = vector.broadcast %187 : vector<16x1xf32> to vector<16x128xf32>
      %189 = arith.mulf %184, %188 : vector<16x128xf32>
      %190 = vector.broadcast %168 : vector<1x128xf32> to vector<16x128xf32>
      %191 = arith.mulf %189, %190 : vector<16x128xf32>
      %192 = vector.broadcast %169 : vector<1x128xf32> to vector<16x128xf32>
      %193 = arith.addf %191, %192 : vector<16x128xf32>
      %c0_85 = arith.constant 0 : index
      %c0_86 = arith.constant 0 : index
      %194 = vector.load %arg18[%c0_85, %c0_86] : memref<16x128xf32, #tpu.memory_space<vmem>>, vector<16x128xf32>
      tpu.vector_store %arg18[%c0_85, %c0_86], %193 {strides = array<i32>} : memref<16x128xf32, #tpu.memory_space<vmem>>, vector<16x128xf32>,
    } else {
    }
    %c0 = arith.constant 0 : index
    %c0_1 = arith.constant 0 : index
    %3 = vector.load %arg18[%c0, %c0_1] : memref<16x128xf32, #tpu.memory_space<vmem>>, vector<16x128xf32>
    %4 = arith.truncf %3 : vector<16x128xf32> to vector<16x128xbf16>
    %c0_2 = arith.constant 0 : index
    %c0_3 = arith.constant 0 : index
    %c0_4 = arith.constant 0 : index
    %5 = vector.load %arg5[%c0_2, %c0_3, %c0_4] : memref<1x128x384xbf16, #tpu.memory_space<vmem>>, vector<1x128x384xbf16>
    %6 = vector.shape_cast %5 : vector<1x128x384xbf16> to vector<128x384xbf16>
    %cst = arith.constant dense<0.000000e+00> : vector<16x384xf32>
    %7 = tpu.matmul %4, %6, %cst {dimension_numbers = #tpu.dot_dimension_numbers<[1], [0], [0], [1], [0, 0, 1, 1], [], []>} : vector<16x128xbf16>, vector<128x384xbf16>, vector<16x384xf32> -> vector<16x384xf32>
    %c0_5 = arith.constant 0 : index
    %c0_6 = arith.constant 0 : index
    %c0_7 = arith.constant 0 : index
    %8 = vector.load %arg6[%c0_5, %c0_6, %c0_7] : memref<1x1x384xf32, #tpu.memory_space<vmem>>, vector<1x1x384xf32>
    %9 = vector.shape_cast %8 : vector<1x1x384xf32> to vector<1x384xf32>
    %10 = vector.broadcast %9 : vector<1x384xf32> to vector<16x384xf32>
    %11 = arith.addf %7, %10 : vector<16x384xf32>
    %12 = vector.extract_strided_slice %11 {offsets = [0, 0], sizes = [16, 128], strides = [1, 1]} : vector<16x384xf32> to vector<16x128xf32>
    %13 = vector.shape_cast %12 : vector<16x128xf32> to vector<2x8x128xf32>
    %14 = vector.extract_strided_slice %11 {offsets = [0, 128], sizes = [16, 128], strides = [1, 1]} : vector<16x384xf32> to vector<16x128xf32>
    %15 = vector.shape_cast %14 : vector<16x128xf32> to vector<2x8x128xf32>
    %16 = vector.extract_strided_slice %11 {offsets = [0, 256], sizes = [16, 128], strides = [1, 1]} : vector<16x384xf32> to vector<16x128xf32>
    %17 = vector.shape_cast %16 : vector<16x128xf32> to vector<2x8x128xf32>
    %c0_8 = arith.constant 0 : index
    %c0_9 = arith.constant 0 : index
    %c0_10 = arith.constant 0 : index
    %18 = vector.load %arg2[%c0_8, %c0_9, %c0_10] : memref<2x1x128xf32, #tpu.memory_space<vmem>>, vector<2x1x128xf32>
    %19 = vector.extract_strided_slice %18 {offsets = [0, 0, 0], sizes = [2, 1, 8], strides = [1, 1, 1]} : vector<2x1x128xf32> to vector<2x1x8xf32>
    %20 = vector.extract_strided_slice %13 {offsets = [0, 0, 0], sizes = [2, 8, 64], strides = [1, 1, 1]} : vector<2x8x128xf32> to vector<2x8x64xf32>
    %21 = arith.truncf %20 : vector<2x8x64xf32> to vector<2x8x64xbf16>
    %22 = vector.extract_strided_slice %15 {offsets = [0, 0, 0], sizes = [2, 8, 64], strides = [1, 1, 1]} : vector<2x8x128xf32> to vector<2x8x64xf32>
    %23 = arith.truncf %22 : vector<2x8x64xf32> to vector<2x8x64xbf16>
    %24 = vector.extract_strided_slice %17 {offsets = [0, 0, 0], sizes = [2, 8, 64], strides = [1, 1, 1]} : vector<2x8x128xf32> to vector<2x8x64xf32>
    %25 = arith.truncf %24 : vector<2x8x64xf32> to vector<2x8x64xbf16>
    "tpu.trace_start"() <{level = 10 : i32, message = "bqd,bkd->bqk"}> : () -> ()
    %cst_11 = arith.constant dense<0.000000e+00> : vector<2x8x8xf32>
    %26 = tpu.matmul %21, %23, %cst_11 {dimension_numbers = #tpu.dot_dimension_numbers<[2], [2], [1], [1], [0, 0, 0, 1, 1, 1], [0], [0]>} : vector<2x8x64xbf16>, vector<2x8x64xbf16>, vector<2x8x8xf32> -> vector<2x8x8xf32>
    "tpu.trace_stop"() : () -> ()
    %cst_12 = arith.constant 1.250000e-01 : f32
    %27 = vector.broadcast %cst_12 : f32 to vector<2x8x8xf32>
    %28 = arith.mulf %26, %27 : vector<2x8x8xf32>
    %29 = vector.broadcast %19 : vector<2x1x8xf32> to vector<2x8x8xf32>
    %30 = arith.addf %28, %29 : vector<2x8x8xf32>
    %cst_13 = arith.constant dense<0xFF800000> : vector<2x8xf32>
    %31 = vector.multi_reduction <maximumf>, %30, %cst_13 [2] : vector<2x8x8xf32> to vector<2x8xf32>
    %32 = vector.shape_cast %31 : vector<2x8xf32> to vector<2x8x1xf32>
    %33 = vector.broadcast %32 : vector<2x8x1xf32> to vector<2x8x8xf32>
    %34 = arith.subf %30, %33 : vector<2x8x8xf32>
    %35 = math.exp %34 : vector<2x8x8xf32>
    %cst_14 = arith.constant dense<0.000000e+00> : vector<2x8xf32>
    %36 = vector.multi_reduction <add>, %35, %cst_14 [2] : vector<2x8x8xf32> to vector<2x8xf32>
    %37 = vector.shape_cast %36 : vector<2x8xf32> to vector<2x8x1xf32>
    %38 = tpu.reciprocal %37 {approx = true} : vector<2x8x1xf32> -> vector<2x8x1xf32>
    %39 = vector.broadcast %38 : vector<2x8x1xf32> to vector<2x8x8xf32>
    %40 = arith.mulf %35, %39 : vector<2x8x8xf32>
    %41 = arith.truncf %40 : vector<2x8x8xf32> to vector<2x8x8xbf16>
    "tpu.trace_start"() <{level = 10 : i32, message = "bqk,bkd->bqd"}> : () -> ()
    %cst_15 = arith.constant dense<0.000000e+00> : vector<2x8x64xf32>
    %42 = tpu.matmul %41, %25, %cst_15 {dimension_numbers = #tpu.dot_dimension_numbers<[2], [1], [1], [2], [0, 0, 0, 1, 1, 2], [0], [0]>} : vector<2x8x8xbf16>, vector<2x8x64xbf16>, vector<2x8x64xf32> -> vector<2x8x64xf32>
    "tpu.trace_stop"() : () -> ()
    %43 = vector.extract_strided_slice %13 {offsets = [0, 0, 64], sizes = [2, 8, 64], strides = [1, 1, 1]} : vector<2x8x128xf32> to vector<2x8x64xf32>
    %44 = arith.truncf %43 : vector<2x8x64xf32> to vector<2x8x64xbf16>
    %45 = vector.extract_strided_slice %15 {offsets = [0, 0, 64], sizes = [2, 8, 64], strides = [1, 1, 1]} : vector<2x8x128xf32> to vector<2x8x64xf32>
    %46 = arith.truncf %45 : vector<2x8x64xf32> to vector<2x8x64xbf16>
    %47 = vector.extract_strided_slice %17 {offsets = [0, 0, 64], sizes = [2, 8, 64], strides = [1, 1, 1]} : vector<2x8x128xf32> to vector<2x8x64xf32>
    %48 = arith.truncf %47 : vector<2x8x64xf32> to vector<2x8x64xbf16>
    "tpu.trace_start"() <{level = 10 : i32, message = "bqd,bkd->bqk"}> : () -> ()
    %cst_16 = arith.constant dense<0.000000e+00> : vector<2x8x8xf32>
    %49 = tpu.matmul %44, %46, %cst_16 {dimension_numbers = #tpu.dot_dimension_numbers<[2], [2], [1], [1], [0, 0, 0, 1, 1, 1], [0], [0]>} : vector<2x8x64xbf16>, vector<2x8x64xbf16>, vector<2x8x8xf32> -> vector<2x8x8xf32>
    "tpu.trace_stop"() : () -> ()
    %cst_17 = arith.constant 1.250000e-01 : f32
    %50 = vector.broadcast %cst_17 : f32 to vector<2x8x8xf32>
    %51 = arith.mulf %49, %50 : vector<2x8x8xf32>
    %52 = vector.broadcast %19 : vector<2x1x8xf32> to vector<2x8x8xf32>
    %53 = arith.addf %51, %52 : vector<2x8x8xf32>
    %cst_18 = arith.constant dense<0xFF800000> : vector<2x8xf32>
    %54 = vector.multi_reduction <maximumf>, %53, %cst_18 [2] : vector<2x8x8xf32> to vector<2x8xf32>
    %55 = vector.shape_cast %54 : vector<2x8xf32> to vector<2x8x1xf32>
    %56 = vector.broadcast %55 : vector<2x8x1xf32> to vector<2x8x8xf32>
    %57 = arith.subf %53, %56 : vector<2x8x8xf32>
    %58 = math.exp %57 : vector<2x8x8xf32>
    %cst_19 = arith.constant dense<0.000000e+00> : vector<2x8xf32>
    %59 = vector.multi_reduction <add>, %58, %cst_19 [2] : vector<2x8x8xf32> to vector<2x8xf32>
    %60 = vector.shape_cast %59 : vector<2x8xf32> to vector<2x8x1xf32>
    %61 = tpu.reciprocal %60 {approx = true} : vector<2x8x1xf32> -> vector<2x8x1xf32>
    %62 = vector.broadcast %61 : vector<2x8x1xf32> to vector<2x8x8xf32>
    %63 = arith.mulf %58, %62 : vector<2x8x8xf32>
    %64 = arith.truncf %63 : vector<2x8x8xf32> to vector<2x8x8xbf16>
    "tpu.trace_start"() <{level = 10 : i32, message = "bqk,bkd->bqd"}> : () -> ()
    %cst_20 = arith.constant dense<0.000000e+00> : vector<2x8x64xf32>
    %65 = tpu.matmul %64, %48, %cst_20 {dimension_numbers = #tpu.dot_dimension_numbers<[2], [1], [1], [2], [0, 0, 0, 1, 1, 2], [0], [0]>} : vector<2x8x8xbf16>, vector<2x8x64xbf16>, vector<2x8x64xf32> -> vector<2x8x64xf32>
    "tpu.trace_stop"() : () -> ()
    %66 = tpu.concatenate %42, %65 in 2 : vector<2x8x64xf32>, vector<2x8x64xf32> -> vector<2x8x128xf32>
    %67 = vector.shape_cast %66 : vector<2x8x128xf32> to vector<16x128xf32>
    %68 = arith.truncf %67 : vector<16x128xf32> to vector<16x128xbf16>
    %c0_21 = arith.constant 0 : index
    %c0_22 = arith.constant 0 : index
    %c0_23 = arith.constant 0 : index
    %69 = vector.load %arg7[%c0_21, %c0_22, %c0_23] : memref<1x128x128xbf16, #tpu.memory_space<vmem>>, vector<1x128x128xbf16>
    %70 = vector.shape_cast %69 : vector<1x128x128xbf16> to vector<128x128xbf16>
    %cst_24 = arith.constant dense<0.000000e+00> : vector<16x128xf32>
    %71 = tpu.matmul %68, %70, %cst_24 {dimension_numbers = #tpu.dot_dimension_numbers<[1], [0], [0], [1], [0, 0, 1, 1], [], []>} : vector<16x128xbf16>, vector<128x128xbf16>, vector<16x128xf32> -> vector<16x128xf32>
    %c0_25 = arith.constant 0 : index
    %c0_26 = arith.constant 0 : index
    %c0_27 = arith.constant 0 : index
    %72 = vector.load %arg8[%c0_25, %c0_26, %c0_27] : memref<1x1x128xf32, #tpu.memory_space<vmem>>, vector<1x1x128xf32>
    %73 = vector.shape_cast %72 : vector<1x1x128xf32> to vector<1x128xf32>
    %74 = vector.broadcast %73 : vector<1x128xf32> to vector<16x128xf32>
    %75 = arith.addf %71, %74 : vector<16x128xf32>
    %76 = arith.addf %3, %75 : vector<16x128xf32>
    %c0_28 = arith.constant 0 : index
    %c0_29 = arith.constant 0 : index
    %c0_30 = arith.constant 0 : index
    %77 = vector.load %arg9[%c0_28, %c0_29, %c0_30] : memref<1x1x128xf32, #tpu.memory_space<vmem>>, vector<1x1x128xf32>
    %78 = vector.shape_cast %77 : vector<1x1x128xf32> to vector<1x128xf32>
    %c0_31 = arith.constant 0 : index
    %c0_32 = arith.constant 0 : index
    %c0_33 = arith.constant 0 : index
    %79 = vector.load %arg10[%c0_31, %c0_32, %c0_33] : memref<1x1x128xf32, #tpu.memory_space<vmem>>, vector<1x1x128xf32>
    %80 = vector.shape_cast %79 : vector<1x1x128xf32> to vector<1x128xf32>
    %cst_34 = arith.constant dense<0.000000e+00> : vector<16xf32>
    %81 = vector.multi_reduction <add>, %76, %cst_34 [1] : vector<16x128xf32> to vector<16xf32>
    %82 = vector.shape_cast %81 : vector<16xf32> to vector<16x1xf32>
    %cst_35 = arith.constant 1.280000e+02 : f32
    %83 = vector.broadcast %cst_35 : f32 to vector<16x1xf32>
    %84 = arith.divf %82, %83 : vector<16x1xf32>
    %85 = arith.mulf %76, %76 : vector<16x128xf32>
    %cst_36 = arith.constant dense<0.000000e+00> : vector<16xf32>
    %86 = vector.multi_reduction <add>, %85, %cst_36 [1] : vector<16x128xf32> to vector<16xf32>
    %87 = vector.shape_cast %86 : vector<16xf32> to vector<16x1xf32>
    %cst_37 = arith.constant 1.280000e+02 : f32
    %88 = vector.broadcast %cst_37 : f32 to vector<16x1xf32>
    %89 = arith.divf %87, %88 : vector<16x1xf32>
    %90 = arith.mulf %84, %84 : vector<16x1xf32>
    %91 = arith.subf %89, %90 : vector<16x1xf32>
    %cst_38 = arith.constant 0.000000e+00 : f32
    %92 = vector.broadcast %cst_38 : f32 to vector<16x1xf32>
    %93 = arith.maximumf %91, %92 : vector<16x1xf32>
    %94 = vector.broadcast %84 : vector<16x1xf32> to vector<16x128xf32>
    %95 = arith.subf %76, %94 : vector<16x128xf32>
    %cst_39 = arith.constant 9.99999996E-13 : f32
    %96 = vector.broadcast %cst_39 : f32 to vector<16x1xf32>
    %97 = arith.addf %93, %96 : vector<16x1xf32>
    %98 = math.rsqrt %97 : vector<16x1xf32>
    %99 = vector.broadcast %98 : vector<16x1xf32> to vector<16x128xf32>
    %100 = arith.mulf %95, %99 : vector<16x128xf32>
    %101 = vector.broadcast %78 : vector<1x128xf32> to vector<16x128xf32>
    %102 = arith.mulf %100, %101 : vector<16x128xf32>
    %103 = vector.broadcast %80 : vector<1x128xf32> to vector<16x128xf32>
    %104 = arith.addf %102, %103 : vector<16x128xf32>
    %105 = arith.truncf %104 : vector<16x128xf32> to vector<16x128xbf16>
    %c0_40 = arith.constant 0 : index
    %c0_41 = arith.constant 0 : index
    %c0_42 = arith.constant 0 : index
    %106 = vector.load %arg11[%c0_40, %c0_41, %c0_42] : memref<1x128x256xbf16, #tpu.memory_space<vmem>>, vector<1x128x256xbf16>
    %107 = vector.shape_cast %106 : vector<1x128x256xbf16> to vector<128x256xbf16>
    %cst_43 = arith.constant dense<0.000000e+00> : vector<16x256xf32>
    %108 = tpu.matmul %105, %107, %cst_43 {dimension_numbers = #tpu.dot_dimension_numbers<[1], [0], [0], [1], [0, 0, 1, 1], [], []>} : vector<16x128xbf16>, vector<128x256xbf16>, vector<16x256xf32> -> vector<16x256xf32>
    %c0_44 = arith.constant 0 : index
    %c0_45 = arith.constant 0 : index
    %c0_46 = arith.constant 0 : index
    %109 = vector.load %arg12[%c0_44, %c0_45, %c0_46] : memref<1x1x256xf32, #tpu.memory_space<vmem>>, vector<1x1x256xf32>
    %110 = vector.shape_cast %109 : vector<1x1x256xf32> to vector<1x256xf32>
    %111 = vector.broadcast %110 : vector<1x256xf32> to vector<16x256xf32>
    %112 = arith.addf %108, %111 : vector<16x256xf32>
    %113 = arith.mulf %112, %112 : vector<16x256xf32>
    %114 = arith.mulf %112, %113 : vector<16x256xf32>
    %cst_47 = arith.constant 4.471500e-02 : f32
    %115 = vector.broadcast %cst_47 : f32 to vector<16x256xf32>
    %116 = arith.mulf %115, %114 : vector<16x256xf32>
    %117 = arith.addf %112, %116 : vector<16x256xf32>
    %cst_48 = arith.constant 0.797884583 : f32
    %118 = vector.broadcast %cst_48 : f32 to vector<16x256xf32>
    %119 = arith.mulf %118, %117 : vector<16x256xf32>
    %120 = math.tanh %119 : vector<16x256xf32>
    %cst_49 = arith.constant 1.000000e+00 : f32
    %121 = vector.broadcast %cst_49 : f32 to vector<16x256xf32>
    %122 = arith.addf %121, %120 : vector<16x256xf32>
    %cst_50 = arith.constant 5.000000e-01 : f32
    %123 = vector.broadcast %cst_50 : f32 to vector<16x256xf32>
    %124 = arith.mulf %123, %122 : vector<16x256xf32>
    %125 = arith.mulf %112, %124 : vector<16x256xf32>
    %126 = arith.truncf %125 : vector<16x256xf32> to vector<16x256xbf16>
    %c0_51 = arith.constant 0 : index
    %c0_52 = arith.constant 0 : index
    %c0_53 = arith.constant 0 : index
    %127 = vector.load %arg13[%c0_51, %c0_52, %c0_53] : memref<1x256x128xbf16, #tpu.memory_space<vmem>>, vector<1x256x128xbf16>
    %128 = vector.shape_cast %127 : vector<1x256x128xbf16> to vector<256x128xbf16>
    %cst_54 = arith.constant dense<0.000000e+00> : vector<16x128xf32>
    %129 = tpu.matmul %126, %128, %cst_54 {dimension_numbers = #tpu.dot_dimension_numbers<[1], [0], [0], [1], [0, 0, 1, 1], [], []>} : vector<16x256xbf16>, vector<256x128xbf16>, vector<16x128xf32> -> vector<16x128xf32>
    %c0_55 = arith.constant 0 : index
    %c0_56 = arith.constant 0 : index
    %c0_57 = arith.constant 0 : index
    %130 = vector.load %arg14[%c0_55, %c0_56, %c0_57] : memref<1x1x128xf32, #tpu.memory_space<vmem>>, vector<1x1x128xf32>
    %131 = vector.shape_cast %130 : vector<1x1x128xf32> to vector<1x128xf32>
    %132 = vector.broadcast %131 : vector<1x128xf32> to vector<16x128xf32>
    %133 = arith.addf %129, %132 : vector<16x128xf32>
    %134 = arith.addf %104, %133 : vector<16x128xf32>
    %c0_58 = arith.constant 0 : index
    %c0_59 = arith.constant 0 : index
    %c0_60 = arith.constant 0 : index
    %135 = vector.load %arg15[%c0_58, %c0_59, %c0_60] : memref<1x1x128xf32, #tpu.memory_space<vmem>>, vector<1x1x128xf32>
    %136 = vector.shape_cast %135 : vector<1x1x128xf32> to vector<1x128xf32>
    %c0_61 = arith.constant 0 : index
    %c0_62 = arith.constant 0 : index
    %c0_63 = arith.constant 0 : index
    %137 = vector.load %arg16[%c0_61, %c0_62, %c0_63] : memref<1x1x128xf32, #tpu.memory_space<vmem>>, vector<1x1x128xf32>
    %138 = vector.shape_cast %137 : vector<1x1x128xf32> to vector<1x128xf32>
    %cst_64 = arith.constant dense<0.000000e+00> : vector<16xf32>
    %139 = vector.multi_reduction <add>, %134, %cst_64 [1] : vector<16x128xf32> to vector<16xf32>
    %140 = vector.shape_cast %139 : vector<16xf32> to vector<16x1xf32>
    %cst_65 = arith.constant 1.280000e+02 : f32
    %141 = vector.broadcast %cst_65 : f32 to vector<16x1xf32>
    %142 = arith.divf %140, %141 : vector<16x1xf32>
    %143 = arith.mulf %134, %134 : vector<16x128xf32>
    %cst_66 = arith.constant dense<0.000000e+00> : vector<16xf32>
    %144 = vector.multi_reduction <add>, %143, %cst_66 [1] : vector<16x128xf32> to vector<16xf32>
    %145 = vector.shape_cast %144 : vector<16xf32> to vector<16x1xf32>
    %cst_67 = arith.constant 1.280000e+02 : f32
    %146 = vector.broadcast %cst_67 : f32 to vector<16x1xf32>
    %147 = arith.divf %145, %146 : vector<16x1xf32>
    %148 = arith.mulf %142, %142 : vector<16x1xf32>
    %149 = arith.subf %147, %148 : vector<16x1xf32>
    %cst_68 = arith.constant 0.000000e+00 : f32
    %150 = vector.broadcast %cst_68 : f32 to vector<16x1xf32>
    %151 = arith.maximumf %149, %150 : vector<16x1xf32>
    %152 = vector.broadcast %142 : vector<16x1xf32> to vector<16x128xf32>
    %153 = arith.subf %134, %152 : vector<16x128xf32>
    %cst_69 = arith.constant 9.99999996E-13 : f32
    %154 = vector.broadcast %cst_69 : f32 to vector<16x1xf32>
    %155 = arith.addf %151, %154 : vector<16x1xf32>
    %156 = math.rsqrt %155 : vector<16x1xf32>
    %157 = vector.broadcast %156 : vector<16x1xf32> to vector<16x128xf32>
    %158 = arith.mulf %153, %157 : vector<16x128xf32>
    %159 = vector.broadcast %136 : vector<1x128xf32> to vector<16x128xf32>
    %160 = arith.mulf %158, %159 : vector<16x128xf32>
    %161 = vector.broadcast %138 : vector<1x128xf32> to vector<16x128xf32>
    %162 = arith.addf %160, %161 : vector<16x128xf32>
    %c0_70 = arith.constant 0 : index
    %c0_71 = arith.constant 0 : index
    %163 = vector.load %arg18[%c0_70, %c0_71] : memref<16x128xf32, #tpu.memory_space<vmem>>, vector<16x128xf32>
    tpu.vector_store %arg18[%c0_70, %c0_71], %162 {strides = array<i32>} : memref<16x128xf32, #tpu.memory_space<vmem>>, vector<16x128xf32>,
    %c1_i32 = arith.constant 1 : i32
    %164 = arith.cmpi eq, %arg0, %c1_i32 : i32
    %165 = arith.extui %164 : i1 to i32
    %c0_i32_72 = arith.constant 0 : i32
    %166 = arith.cmpi ne, %165, %c0_i32_72 : i32
    scf.if %166 {
      %c0_73 = arith.constant 0 : index
      %c0_74 = arith.constant 0 : index
      %167 = tpu.strided_load %arg18[%c0_73, %c0_74] {strides = array<i32: 8, 1>} : memref<16x128xf32, #tpu.memory_space<vmem>>, vector<2x128xf32>
      %c0_75 = arith.constant 0 : index
      %c0_76 = arith.constant 0 : index
      %168 = vector.load %arg17[%c0_75, %c0_76] : memref<2x128xf32, #tpu.memory_space<vmem>>, vector<2x128xf32>
      tpu.vector_store %arg17[%c0_75, %c0_76], %167 {strides = array<i32>} : memref<2x128xf32, #tpu.memory_space<vmem>>, vector<2x128xf32>,
    } else {
    }
    return
  }
  func.func @transform_0(%arg0: i32) -> (i32, i32) {
    %c0_i32 = arith.constant 0 : i32
    %c0_i32_0 = arith.constant 0 : i32
    %c0_i32_1 = arith.constant 0 : i32
    return %c0_i32, %c0_i32_0 : i32, i32
  }
  func.func @transform_1(%arg0: i32) -> (i32, i32, i32) {
    %c0_i32 = arith.constant 0 : i32
    %c0_i32_0 = arith.constant 0 : i32
    %c0_i32_1 = arith.constant 0 : i32
    %c0_i32_2 = arith.constant 0 : i32
    return %c0_i32, %c0_i32_0, %c0_i32_1 : i32, i32, i32
  }
  func.func @transform_2(%arg0: i32) -> (i32, i32) {
    %c0_i32 = arith.constant 0 : i32
    %c0_i32_0 = arith.constant 0 : i32
    %c0_i32_1 = arith.constant 0 : i32
    return %c0_i32, %c0_i32_0 : i32, i32
  }
  func.func @transform_3(%arg0: i32) -> (i32, i32) {
    %c0_i32 = arith.constant 0 : i32
    %c0_i32_0 = arith.constant 0 : i32
    %c0_i32_1 = arith.constant 0 : i32
    return %c0_i32, %c0_i32_0 : i32, i32
  }
  func.func @transform_4(%arg0: i32) -> (i32, i32, i32) {
    %c0_i32 = arith.constant 0 : i32
    %c0_i32_0 = arith.constant 0 : i32
    %c0_i32_1 = arith.constant 0 : i32
    return %arg0, %c0_i32, %c0_i32_0 : i32, i32, i32
  }
  func.func @transform_5(%arg0: i32) -> (i32, i32, i32) {
    %c0_i32 = arith.constant 0 : i32
    %c0_i32_0 = arith.constant 0 : i32
    %c0_i32_1 = arith.constant 0 : i32
    return %arg0, %c0_i32, %c0_i32_0 : i32, i32, i32
  }
  func.func @transform_6(%arg0: i32) -> (i32, i32, i32) {
    %c0_i32 = arith.constant 0 : i32
    %c0_i32_0 = arith.constant 0 : i32
    %c0_i32_1 = arith.constant 0 : i32
    return %arg0, %c0_i32, %c0_i32_0 : i32, i32, i32
  }
  func.func @transform_7(%arg0: i32) -> (i32, i32, i32) {
    %c0_i32 = arith.constant 0 : i32
    %c0_i32_0 = arith.constant 0 : i32
    %c0_i32_1 = arith.constant 0 : i32
    return %arg0, %c0_i32, %c0_i32_0 : i32, i32, i32
  }
  func.func @transform_8(%arg0: i32) -> (i32, i32, i32) {
    %c0_i32 = arith.constant 0 : i32
    %c0_i32_0 = arith.constant 0 : i32
    %c0_i32_1 = arith.constant 0 : i32
    return %arg0, %c0_i32, %c0_i32_0 : i32, i32, i32
  }
  func.func @transform_9(%arg0: i32) -> (i32, i32, i32) {
    %c0_i32 = arith.constant 0 : i32
    %c0_i32_0 = arith.constant 0 : i32
    %c0_i32_1 = arith.constant 0 : i32
    return %arg0, %c0_i32, %c0_i32_0 : i32, i32, i32
  }
  func.func @transform_10(%arg0: i32) -> (i32, i32, i32) {
    %c0_i32 = arith.constant 0 : i32
    %c0_i32_0 = arith.constant 0 : i32
    %c0_i32_1 = arith.constant 0 : i32
    return %arg0, %c0_i32, %c0_i32_0 : i32, i32, i32
  }
  func.func @transform_11(%arg0: i32) -> (i32, i32, i32) {
    %c0_i32 = arith.constant 0 : i32
    %c0_i32_0 = arith.constant 0 : i32
    %c0_i32_1 = arith.constant 0 : i32
    return %arg0, %c0_i32, %c0_i32_0 : i32, i32, i32
  }
  func.func @transform_12(%arg0: i32) -> (i32, i32, i32) {
    %c0_i32 = arith.constant 0 : i32
    %c0_i32_0 = arith.constant 0 : i32
    %c0_i32_1 = arith.constant 0 : i32
    return %arg0, %c0_i32, %c0_i32_0 : i32, i32, i32
  }
  func.func @transform_13(%arg0: i32) -> (i32, i32, i32) {
    %c0_i32 = arith.constant 0 : i32
    %c0_i32_0 = arith.constant 0 : i32
    %c0_i32_1 = arith.constant 0 : i32
    return %arg0, %c0_i32, %c0_i32_0 : i32, i32, i32
  }
  func.func @transform_14(%arg0: i32) -> (i32, i32, i32) {
    %c0_i32 = arith.constant 0 : i32
    %c0_i32_0 = arith.constant 0 : i32
    %c0_i32_1 = arith.constant 0 : i32
    return %arg0, %c0_i32, %c0_i32_0 : i32, i32, i32
  }
  func.func @transform_15(%arg0: i32) -> (i32, i32, i32) {
    %c0_i32 = arith.constant 0 : i32
    %c0_i32_0 = arith.constant 0 : i32
    %c0_i32_1 = arith.constant 0 : i32
    return %arg0, %c0_i32, %c0_i32_0 : i32, i32, i32
  }
  func.func @transform_16(%arg0: i32) -> (i32, i32) {
    %c0_i32 = arith.constant 0 : i32
    %c0_i32_0 = arith.constant 0 : i32
    %c0_i32_1 = arith.constant 0 : i32
    return %c0_i32, %c0_i32_0 : i32, i32
  }
}

module attributes {stable_mosaic.version = 11 : i64} {
  func.func @heads_kernel(%arg0: memref<2x128xf32, #tpu.memory_space<vmem>>, %arg1: memref<128x384xbf16, #tpu.memory_space<vmem>>, %arg2: memref<1x384xf32, #tpu.memory_space<vmem>>, %arg3: memref<384x128xbf16, #tpu.memory_space<vmem>>, %arg4: memref<1x128xf32, #tpu.memory_space<vmem>>, %arg5: memref<2x128xf32, #tpu.memory_space<vmem>>) attributes {dimension_semantics = [], scalar_prefetch = 0 : i64, scratch_operands = 0 : i64, tpu.core_type = #tpu.core_type<tc>} {
    %c0 = arith.constant 0 : index
    %c0_0 = arith.constant 0 : index
    %0 = vector.load %arg0[%c0, %c0_0] : memref<2x128xf32, #tpu.memory_space<vmem>>, vector<2x128xf32>
    %1 = arith.truncf %0 : vector<2x128xf32> to vector<2x128xbf16>
    %c0_1 = arith.constant 0 : index
    %c0_2 = arith.constant 0 : index
    %2 = vector.load %arg1[%c0_1, %c0_2] : memref<128x384xbf16, #tpu.memory_space<vmem>>, vector<128x384xbf16>
    %cst = arith.constant dense<0.000000e+00> : vector<2x384xf32>
    %3 = tpu.matmul %1, %2, %cst {dimension_numbers = #tpu.dot_dimension_numbers<[1], [0], [0], [1], [0, 0, 1, 1], [], []>} : vector<2x128xbf16>, vector<128x384xbf16>, vector<2x384xf32> -> vector<2x384xf32>
    %c0_3 = arith.constant 0 : index
    %c0_4 = arith.constant 0 : index
    %4 = vector.load %arg2[%c0_3, %c0_4] : memref<1x384xf32, #tpu.memory_space<vmem>>, vector<1x384xf32>
    %5 = vector.broadcast %4 : vector<1x384xf32> to vector<2x384xf32>
    %6 = arith.addf %3, %5 : vector<2x384xf32>
    %cst_5 = arith.constant 0.000000e+00 : f32
    %7 = vector.broadcast %cst_5 : f32 to vector<2x384xf32>
    %8 = arith.maximumf %6, %7 : vector<2x384xf32>
    %9 = arith.truncf %8 : vector<2x384xf32> to vector<2x384xbf16>
    %c0_6 = arith.constant 0 : index
    %c0_7 = arith.constant 0 : index
    %10 = vector.load %arg3[%c0_6, %c0_7] : memref<384x128xbf16, #tpu.memory_space<vmem>>, vector<384x128xbf16>
    %cst_8 = arith.constant dense<0.000000e+00> : vector<2x128xf32>
    %11 = tpu.matmul %9, %10, %cst_8 {dimension_numbers = #tpu.dot_dimension_numbers<[1], [0], [0], [1], [0, 0, 1, 1], [], []>} : vector<2x384xbf16>, vector<384x128xbf16>, vector<2x128xf32> -> vector<2x128xf32>
    %c0_9 = arith.constant 0 : index
    %c0_10 = arith.constant 0 : index
    %12 = vector.load %arg4[%c0_9, %c0_10] : memref<1x128xf32, #tpu.memory_space<vmem>>, vector<1x128xf32>
    %13 = vector.broadcast %12 : vector<1x128xf32> to vector<2x128xf32>
    %14 = arith.addf %11, %13 : vector<2x128xf32>
    %c0_11 = arith.constant 0 : index
    %c0_12 = arith.constant 0 : index
    %15 = vector.load %arg5[%c0_11, %c0_12] : memref<2x128xf32, #tpu.memory_space<vmem>>, vector<2x128xf32>
    tpu.vector_store %arg5[%c0_11, %c0_12], %14 {strides = array<i32>} : memref<2x128xf32, #tpu.memory_space<vmem>>, vector<2x128xf32>,
    return
  }
}

</mosaic_0001>

<bundles_post_ra>
// kernel: distilbert_class_forward.3
= control target key start
LH: loop header
LB: loop body
LE: loop exit
PB: predicated region body
PF: predicated region fallthrough
CT: control target
= control target key end

     0   :  { %v759_v1 = vmov 0.0   ;;  %v760_v2 = vmov 0   ;;  %vm761_vm0 = vmmov 0   ;;  %v57_v52 = vlaneseq  ;;  %s968_s1 = inlined_call_operand.vmem [shape: bf16[128,384], index: 1, kind: input, shape index: {}]   ;;  %s969_s3 = inlined_call_operand.vmem [shape: bf16[384,128], index: 3, kind: input, shape index: {}]   ;;  %s970_s0 = inlined_call_operand.vmem [shape: f32[2,128], index: 0, kind: input, shape index: {}]   ;;  %s971_s2 = inlined_call_operand.vmem [shape: f32[1,384], index: 2, kind: input, shape index: {}]   ;;  %s972_s4 = inlined_call_operand.vmem [shape: f32[1,128], index: 4, kind: input, shape index: {}]   ;;  %s973_s5 = inlined_call_operand.vmem [shape: f32[2,128], index: 5, kind: output, shape index: {}]  }
   0x1   :  { %v703_v0 = vld [vmem:[%s968_s1 + $0xac] ss:$12 sps:$4 sm:$0xff]   ;;  %660 = vmatprep.subr.bf16.mxu1 %v759_v1  ;;  %232 = vmatprep.mubr.bf16.mxu0 %v760_v2  ;;  %v705_v3 = vld [vmem:[%s968_s1 + $0xa8] ss:$12 sps:$4 sm:$0xff]   ;;  %v706_v4 = vld [vmem:[%s968_s1 + $0xb0] ss:$12 sps:$4 sm:$0xff]  }
   0x2   :  { %676 = vmatprep.mubr.msk.bf16.mxu1 %vm761_vm0, %v759_v1  ;;  %200 = vmatprep.subr.bf16.mxu0 %v703_v0  ;;  %v707_v5 = vld [vmem:[%s968_s1 + $0x94] ss:$12 sps:$4 sm:$0xff]   ;;  %v709_v6 = vld [vmem:[%s968_s1 + $0x90] ss:$12 sps:$4 sm:$0xff]   ;;  %v710_v7 = vld [vmem:[%s968_s1 + $0x98] ss:$12 sps:$4 sm:$0xff]  }
   0x3   :  { %201 = vmatpush1.bf16.msra.mxu0 %v705_v3  ;;  %661 = vmatpush3.bf16.msra.mxu1 %v706_v4  ;;  %v711_v8 = vld [vmem:[%s968_s1 + $0x7c] ss:$12 sps:$4 sm:$0xff]   ;;  %v713_v9 = vld [vmem:[%s968_s1 + $0x78] ss:$12 sps:$4 sm:$0xff]   ;;  %v714_v10 = vld [vmem:[%s968_s1 + $0x80] ss:$12 sps:$4 sm:$0xff]  }
   0x4   :  { %202 = vmatprep.subr.bf16.mxu0 %v707_v5  ;;  %662 = vmatprep.subr.bf16.mxu1 %v759_v1  ;;  %v715_v11 = vld [vmem:[%s968_s1 + $0x64] ss:$12 sps:$4 sm:$0xff]   ;;  %v717_v12 = vld [vmem:[%s968_s1 + $0x60] ss:$12 sps:$4 sm:$0xff]   ;;  %v718_v13 = vld [vmem:[%s968_s1 + $0x68] ss:$12 sps:$4 sm:$0xff]  }
   0x5   :  { %v719_v14 = vld [vmem:[%s968_s1 + $0x4c] ss:$12 sps:$4 sm:$0xff]   ;;  %v721_v15 = vld [vmem:[%s968_s1 + $0x48] ss:$12 sps:$4 sm:$0xff]   ;;  %v722_v16 = vld [vmem:[%s968_s1 + $0x50] ss:$12 sps:$4 sm:$0xff]  }
   0x6   :  { %v723_v17 = vld [vmem:[%s968_s1 + $0x34] ss:$12 sps:$4 sm:$0xff]   ;;  %v725_v18 = vld [vmem:[%s968_s1 + $0x30] ss:$12 sps:$4 sm:$0xff]   ;;  %v726_v19 = vld [vmem:[%s968_s1 + $0x38] ss:$12 sps:$4 sm:$0xff]  }
   0x7   :  { %203 = vmatpush1.bf16.msra.mxu0 %v709_v6  ;;  %663 = vmatpush3.bf16.msra.mxu1 %v710_v7  ;;  %v727_v20 = vld [vmem:[%s968_s1 + $0x1c] ss:$12 sps:$4 sm:$0xff]   ;;  %v729_v21 = vld [vmem:[%s968_s1 + $0x18] ss:$12 sps:$4 sm:$0xff]   ;;  %v730_v22 = vld [vmem:[%s968_s1 + $0x20] ss:$12 sps:$4 sm:$0xff]  }
   0x8   :  { %204 = vmatprep.subr.bf16.mxu0 %v711_v8  ;;  %664 = vmatprep.subr.bf16.mxu1 %v759_v1  ;;  %v731_v23 = vld [vmem:[%s968_s1 + $0x4] ss:$12 sps:$4 sm:$0xff]   ;;  %v733_v24 = vld [vmem:[%s968_s1] ss:$12 sps:$4 sm:$0xff]   ;;  %v734_v25 = vld [vmem:[%s968_s1 + $0x8] ss:$12 sps:$4 sm:$0xff]  }
   0x9   :  { %v21_v26 = vld [vmem:[%s970_s0] sm:$0x3]  ;;  %v736_v27 = vld [vmem:[%s969_s3 + $0x78] sm:$0xff]   ;;  %v739_v31 = vld [vmem:[%s969_s3 + $0x70] sm:$0xff]   ;;  %v58_v53 = vshrl.u32 %v57_v52, 7 }
   0xa   :  { %v22_v28 = vpack.c.bf16 %v21_v26, %v21_v26  ;;  %v735_v29 = vld [vmem:[%s969_s3 + $0xb8] sm:$0xff]   ;;  %v738_v32 = vld [vmem:[%s969_s3 + $0xb0] sm:$0xff]   ;;  %v742_v34 = vld [vmem:[%s969_s3 + $0x68] sm:$0xff]  }
   0xb   :  { %205 = vmatpush1.bf16.msra.mxu0 %v713_v9  ;;  %665 = vmatpush3.bf16.msra.mxu1 %v714_v10  ;;  %v737_v30 = vld [vmem:[%s969_s3 + $0x38] sm:$0xff]   ;;  %v740_v33 = vld [vmem:[%s969_s3 + $0x30] sm:$0xff]   ;;  %v743_v35 = vld [vmem:[%s969_s3 + $0x28] sm:$0xff]   ;;  %v59_v54 = vsub.s32 0, %v58_v53  ;;  %v67_v56 = vsub.s32 2, %v58_v53  ;;  %v63_v57 = vsub.s32 1, %v58_v53 }
   0xc   :  { %206 = vmatprep.subr.bf16.mxu0 %v715_v11  ;;  %666 = vmatprep.subr.bf16.mxu1 %v759_v1  ;;  %v741_v36 = vld [vmem:[%s969_s3 + $0xa8] sm:$0xff]   ;;  %v745_v37 = vld [vmem:[%s969_s3 + $0x60] sm:$0xff]   ;;  %v748_v40 = vld [vmem:[%s969_s3 + $0x58] sm:$0xff]  }
   0xd   :  { %v746_v38 = vld [vmem:[%s969_s3 + $0x20] sm:$0xff]   ;;  %v749_v41 = vld [vmem:[%s969_s3 + $0x18] sm:$0xff]   ;;  %v751_v43 = vld [vmem:[%s969_s3 + $0x50] sm:$0xff]  }
   0xe   :  { %v744_v39 = vld [vmem:[%s969_s3 + $0xa0] sm:$0xff]   ;;  %v747_v42 = vld [vmem:[%s969_s3 + $0x98] sm:$0xff]   ;;  %v752_v44 = vld [vmem:[%s969_s3 + $0x10] sm:$0xff]  }
   0xf   :  { %207 = vmatpush1.bf16.msra.mxu0 %v717_v12  ;;  %667 = vmatpush3.bf16.msra.mxu1 %v718_v13  ;;  %v750_v45 = vld [vmem:[%s969_s3 + $0x90] sm:$0xff]   ;;  %v753_v46 = vld [vmem:[%s969_s3 + $0x88] sm:$0xff]   ;;  %v756_v49 = vld [vmem:[%s969_s3 + $0x80] sm:$0xff]  }
  0x10   :  { %208 = vmatprep.subr.bf16.mxu0 %v719_v14  ;;  %668 = vmatprep.subr.bf16.mxu1 %v759_v1  ;;  %v754_v47 = vld [vmem:[%s969_s3 + $0x48] sm:$0xff]   ;;  %v757_v50 = vld [vmem:[%s969_s3 + $0x40] sm:$0xff]  }
  0x11   :  { %v755_v48 = vld [vmem:[%s969_s3 + $0x8] sm:$0xff]   ;;  %v758_v51 = vld [vmem:[%s969_s3] sm:$0xff]  }
  0x12   :  { %v55_v55 = vld [vmem:[%s971_s2] sm:$0x7] }
  0x13   :  { %209 = vmatpush1.bf16.msra.mxu0 %v721_v15  ;;  %669 = vmatpush3.bf16.msra.mxu1 %v722_v16  ;;  %v60_v58 = vrot.slane %v55_v55, %v59_v54  ;;  %v68_v59 = vrot.slane %v55_v55, %v67_v56  ;;  %v64_v60 = vrot.slane %v55_v55, %v63_v57 }
  0x14   :  { %210 = vmatprep.subr.bf16.mxu0 %v723_v17  ;;  %670 = vmatprep.subr.bf16.mxu1 %v759_v1 }
  0x17   :  { %211 = vmatpush1.bf16.msra.mxu0 %v725_v18  ;;  %671 = vmatpush3.bf16.msra.mxu1 %v726_v19  ;;  %v595_v18 = vld [vmem:[%s972_s4] ss:$0 sm:$0xff] }
  0x18   :  { %212 = vmatprep.subr.bf16.mxu0 %v727_v20  ;;  %672 = vmatprep.subr.bf16.mxu1 %v759_v1 }
  0x1b   :  { %213 = vmatpush1.bf16.msra.mxu0 %v729_v21  ;;  %673 = vmatpush3.bf16.msra.mxu1 %v730_v22 }
  0x1c   :  { %214 = vmatprep.subr.bf16.mxu0 %v731_v23  ;;  %674 = vmatprep.subr.bf16.mxu1 %v759_v1 }
  0x1f   :  { %215 = vmatpush1.bf16.msra.mxu0 %v733_v24  ;;  %675 = vmatpush3.bf16.msra.mxu1 %v734_v25 }
  0x20   :  { %629 = vmatprep.subr.bf16.mxu0 %v736_v27  ;;  %680 = vmatprep.subr.bf16.mxu1 %v759_v1 }
  0x22   :  { %233 = vmatmul.mubr.bf16.vlgmr.msra.gmra.mxu0 %v22_v28  ;;  %677 = vmatmul.mubr.bf16.vlgmr.msra.gmra.mxu1 %v22_v28 }
  0x23   :  { %630 = vmatpush3.bf16.msra.mxu0 %v737_v30  ;;  %681 = vmatpush3.bf16.msra.mxu1 %v735_v29 }
  0x24   :  { %631 = vmatprep.subr.bf16.mxu0 %v739_v31  ;;  %682 = vmatprep.subr.bf16.mxu1 %v759_v1 }
  0x25   :  { %696 = vmatprep.mubr.msk.bf16.mxu1 %vm761_vm0, %v759_v1 }
  0x27   :  { %632 = vmatpush3.bf16.msra.mxu0 %v740_v33  ;;  %683 = vmatpush3.bf16.msra.mxu1 %v738_v32 }
  0x28   :  { %633 = vmatprep.subr.bf16.mxu0 %v742_v34  ;;  %684 = vmatprep.subr.bf16.mxu1 %v759_v1 }
  0x2b   :  { %634 = vmatpush3.bf16.msra.mxu0 %v743_v35  ;;  %685 = vmatpush3.bf16.msra.mxu1 %v741_v36 }
  0x2c   :  { %635 = vmatprep.subr.bf16.mxu0 %v745_v37  ;;  %686 = vmatprep.subr.bf16.mxu1 %v759_v1 }
  0x2f   :  { %636 = vmatpush3.bf16.msra.mxu0 %v746_v38  ;;  %687 = vmatpush3.bf16.msra.mxu1 %v744_v39 }
  0x30   :  { %637 = vmatprep.subr.bf16.mxu0 %v748_v40  ;;  %688 = vmatprep.subr.bf16.mxu1 %v759_v1 }
  0x33   :  { %638 = vmatpush3.bf16.msra.mxu0 %v749_v41  ;;  %689 = vmatpush3.bf16.msra.mxu1 %v747_v42 }
  0x34   :  { %639 = vmatprep.subr.bf16.mxu0 %v751_v43  ;;  %690 = vmatprep.subr.bf16.mxu1 %v759_v1 }
  0x37   :  { %640 = vmatpush3.bf16.msra.mxu0 %v752_v44  ;;  %691 = vmatpush3.bf16.msra.mxu1 %v750_v45 }
  0x38   :  { %692 = vmatprep.subr.bf16.mxu1 %v759_v1  ;;  %641 = vmatprep.subr.bf16.mxu0 %v754_v47 }
  0x3b   :  { %693 = vmatpush3.bf16.msra.mxu1 %v753_v46  ;;  %642 = vmatpush3.bf16.msra.mxu0 %v755_v48 }
  0x3c   :  { %694 = vmatprep.subr.bf16.mxu1 %v759_v1  ;;  %643 = vmatprep.subr.bf16.mxu0 %v757_v50 }
  0x3f   :  { %695 = vmatpush3.bf16.msra.mxu1 %v756_v49  ;;  %644 = vmatpush3.bf16.msra.mxu0 %v758_v51 }
  0xe2   :  { %v234_v61 = vpop.f32.mrf.mxu0  ;;  %v275_v63 = vpop.f32.mrf.mxu1 }
  0xe3   :  { %v235_v62 = vadd.f32 %v234_v61, %v60_v58  ;;  %v276_v0 = vadd.f32 %v275_v63, %v68_v59 }
  0xe4   :  { %v236_v1 = vpop.f32.mrf.mxu0  ;;  %v678_v3 = vpop.f32.mrf.mxu1 }
  0xe5   :  { %v237_v2 = vadd.f32 %v236_v1, %v64_v60  ;;  %v281_v4 = vmax.f32 %v235_v62, 0.0  ;;  %v283_v5 = vmax.f32 %v276_v0, 0.0 }
  0xe6   :  { %v238_v6 = vpop.f32.mrf.mxu0  ;;  %v278_v8 = vpop.f32.mrf.mxu1 }
  0xe7   :  { %v282_v7 = vmax.f32 %v237_v2, 0.0  ;;  %v286_v9 = vpack.c.bf16 %v283_v5, %v283_v5  ;;  %v284_v13 = vpack.c.bf16 %v281_v4, %v281_v4 }
  0xe8   :  { %v239_v10 = vpop.f32.mrf.mxu0  ;;  %v679_v12 = vpop.f32.mrf.mxu1 }
  0xe9   :  { %v285_v11 = vpack.c.bf16 %v282_v7, %v282_v7  ;;  %697 = vmatmul.mubr.bf16.vlgmr.msra.gmra.mxu1 %v286_v9 }
  0xeb   :  { %518 = vmatprep.mubr.bf16.mxu0 %v285_v11 }
  0xec   :  { %519 = vmatmul.mubr.bf16.vlgmr.msra.gmra.mxu0 %v284_v13 }
 0x1a9   :  { %v560_v14 = vpop.f32.mrf.mxu1 }
 0x1ab   :  { %v698_v15 = vpop.f32.mrf.mxu1 }
 0x1ac   :  { %v645_v16 = vpop.f32.mrf.mxu0 }
 0x1ad   :  { %v563_v17 = vpop.f32.mrf.mxu1 }
 0x1ae   :  { %v646_v19 = vpop.f32.mrf.mxu0 }
 0x1af   :  { %v647_v20 = vadd.f32 %v646_v19, %v645_v16  ;;  %v699_v21 = vpop.f32.mrf.mxu1 }
 0x1b0   :  { %v648_v22 = vpop.f32.mrf.mxu0 }
 0x1b1   :  { %v521_v23 = vadd.f32 %v647_v20, %v595_v18 }
 0x1b2   :  { %v649_v24 = vpop.f32.mrf.mxu0 }
 0x1b3   :  { %v561_v25 = vadd.f32 %v560_v14, %v521_v23 }
 0x1b5   :  { %566 = vst [vmem:[%s973_s5] sm:$0x3] %v561_v25 }

// kernel: distilbert_class_forward.2
= control target key start
LH: loop header
LB: loop body
LE: loop exit
PB: predicated region body
PF: predicated region fallthrough
CT: control target
= control target key end

     0   :  { %s3436_s0 = inlined_call_operand.vmem [shape: f32[16,128], index: 0, kind: input, shape index: {}]   ;;  %s3437_s1 = inlined_call_operand.vmem [shape: f32[2,1,128], index: 1, kind: input, shape index: {}]   ;;  %s3438_s2 = inlined_call_operand.vmem [shape: f32[1,128], index: 2, kind: input, shape index: {}]   ;;  %s3439_s3 = inlined_call_operand.vmem [shape: f32[1,128], index: 3, kind: input, shape index: {}]   ;;  %s3440_s4 = inlined_call_operand.hbm [shape: bf16[2,128,384], index: 4, kind: input, shape index: {}]   ;;  %s3441_s5 = inlined_call_operand.vmem [shape: f32[2,1,384], index: 5, kind: input, shape index: {}]   ;;  %s3442_s6 = inlined_call_operand.vmem [shape: bf16[2,128,128], index: 6, kind: input, shape index: {}]   ;;  %s3443_s7 = inlined_call_operand.vmem [shape: f32[2,1,128], index: 7, kind: input, shape index: {}]   ;;  %s3444_s8 = inlined_call_operand.vmem [shape: f32[2,1,128], index: 8, kind: input, shape index: {}]   ;;  %s3445_s9 = inlined_call_operand.vmem [shape: f32[2,1,128], index: 9, kind: input, shape index: {}]   ;;  %s3446_s10 = inlined_call_operand.hbm [shape: bf16[2,128,256], index: 10, kind: input, shape index: {}]   ;;  %s3447_s11 = inlined_call_operand.vmem [shape: f32[2,1,256], index: 11, kind: input, shape index: {}]   ;;  %s3448_s12 = inlined_call_operand.hbm [shape: bf16[2,256,128], index: 12, kind: input, shape index: {}]   ;;  %s3449_s13 = inlined_call_operand.vmem [shape: f32[2,1,128], index: 13, kind: input, shape index: {}]   ;;  %s3450_s14 = inlined_call_operand.vmem [shape: f32[2,1,128], index: 14, kind: input, shape index: {}]   ;;  %s3451_s15 = inlined_call_operand.vmem [shape: f32[2,1,128], index: 15, kind: input, shape index: {}]   ;;  %s3452_s16 = inlined_call_operand.vmem [shape: f32[2,128], index: 16, kind: output, shape index: {}]  }
   0x1   :  { %3461 = sst [smem:[#allocation13_spill]] %s3436_s0 }
   0x2   :  { %3462 = sst [smem:[#allocation14_spill]] %s3437_s1 }
   0x3   :  { %3463 = sst [smem:[#allocation15_spill]] %s3438_s2 }
   0x4   :  { %3464 = sst [smem:[#allocation16_spill]] %s3439_s3 }
   0x5   :  { %3465 = sst [smem:[#allocation17_spill]] %s3440_s4 }
   0x6   :  { %3466 = sst [smem:[#allocation18_spill]] %s3441_s5 }
   0x7   :  { %3467 = sst [smem:[#allocation19_spill]] %s3442_s6 }
   0x8   :  { %3468 = sst [smem:[#allocation20_spill]] %s3446_s10 }
   0x9   :  { %3469 = sst [smem:[#allocation21_spill]] %s3448_s12 }
   0xa   :  { %3470 = sst [smem:[#allocation22_spill]] %s3450_s14 }
   0xb   :  { %3471 = sst [smem:[#allocation23_spill]] %s3451_s15 }
   0xc   :  { %3472 = sst [smem:[#allocation24_spill]] %s3452_s16 }
   0xd   :  { %21 = vsyncpa [#allocation4], 0 }
   0xe   :  { %23 = vsyncpa [#allocation4 + $0x1], 0 }
   0xf   :  { %24 = vsyncpa [#allocation6], 0 }
  0x10   :  { %26 = vsyncpa [#allocation6 + $0x1], 0  ;;  %s2948_s21 = smov 0   ;;  %s2950_s22 = smov 0  }
  0x11   :  { %s2952_s23 = smov 0   ;;  %s2954_s24 = smov 0  }
  0x12 LB: > { %3473 = sst [smem:[#allocation10_spill]] %s2844_s23  ;;  %s2967_s25 = sadd.s32 4294967295, %s2848_s24   ;;  %s2848_s24 = sphi %s2954_s24, %s3500_s24   ;;  %s2844_s23 = sphi %s2952_s23, %s3502_s23   ;;  %s2840_s22 = sphi %s2950_s22, %s3504_s22   ;;  %s2836_s21 = sphi %s2948_s21, %s3503_s21  }
  0x13   : > { %s2970_s26 = sadd.s32 1, %s2848_s24   ;;  %s123_s28 = sadd.s32 1, %s2844_s23 }
  0x14   : > { %3474 = sst [smem:[#allocation11_spill]] %s2970_s26  ;;  %s120_s27 = ssub.s32 %s2848_s24, %s2970_s26 }
  0x15   : > { %p121_p0 = scmp.eq.s32.totalorder %s120_s27, 0  ;;  %p130_p1 = scmp.ne.s32.totalorder %s2844_s23, %s2840_s22 }
  0x16   : > { %p131_p2 = scmp.eq.s32.totalorder %s2848_s24, 0  ;;  %p136_p3 = scmp.ne.s32.totalorder %s2840_s22, %s2836_s21 }
  0x17   : > { %s2980_s29 = scalar_select %p121_p0, %s2844_s23, %s123_s28  }
  0x18   : > { %p132_p4 = por %p131_p2, %p130_p1  ;;  %p137_p5 = scmp.eq.s32.totalorder %s2967_s25, 0 }
  0x19   : > { %3475 = sst [smem:[#allocation12_spill]] %s2980_s29  ;;  %p2562_p6 = scmp.lt.s32.totalorder %s2848_s24, 2 }
  0x1a   : > { %p2984_p7 = por %p137_p5, %p136_p3  ;;  %s2989_s0 = sand.u32 1, %s2844_s23  }
  0x1b   : > { %p2991_p8 = pnand %p2562_p6, %p132_p4  ;;  %s533_s18 = sand.u32 1, %s2848_s24  }
  0x1c   : > { %s3476_s30 = scalar_select %p2984_p7, 1, 0 }
  0x1d   : > { %s3458_s19 = sshll.u32 %s2989_s0, 7  ;;  %s3459_s20 = sshll.u32 %s2848_s24, 11 }
  0x1e   : > { %s537_s21 = scalar_lea.vmem [#allocation5], %s3458_s19  ;;  %s3478_s10 = sld [smem:[#allocation20_spill]] }
  0x1f   : > { %s544_s27 = sshll.u32 %s537_s21, 4  ;;  %s3009_s23 = scalar_lea.sflag [#allocation6], %s533_s18  ;;  %s3007_s27 = int_to_ptr.vmem [resolvable:$true] %s544_s27 }
  0x20   : > { %p3015_p10 = pneg %p2991_p8 }
  0x24   : > { %s3005_s26 = scalar_lea.hbm %s3478_s10, %s3459_s20  ;;  %s2731_s28 = scalar_lea.hbm %s3478_s10, 4096 }
  0x25   : > { %s2726_s16 = scalar_lea.hbm %s3005_s26, 2048  ;;  %p2732_p13 = scmp.lt.s32.totalorder %s3005_s26, %s3478_s10 }
  0x26   : > { %p2727_p9 = scmp.ne.s32.totalorder %s3005_s26, %s2726_s16  ;;  %p2733_p0 = scmp.lt.s32.totalorder %s2731_s28, %s2726_s16 }
  0x28   : > { %p2729_p11 = pnand %p3015_p10, %p2727_p9  ;;  %p2734_p1 = por %p2733_p0, %p2732_p13 }
  0x2a   : > { %p2730_p12 = pneg %p2729_p11 }
  0x2c   : > { %p2735_p2 = pnand %p2734_p1, %p2730_p12 }
  0x2e   : > { %2738 = shalt.err (!%p2735_p2)
}
  0x2f   : > { %s2739_s18 = scalar_lea.vmem %s3007_s27, 2048  ;;  %s2850_s3 = smov [#allocation5]  }
  0x30   : > { %p2740_p3 = scmp.ne.s32.totalorder %s3007_s27, %s2739_s18  ;;  %s2744_s29 = sshll.u32 %s2850_s3, 4  ;;  %s2745_s29 = int_to_ptr.vmem [resolvable:$false] %s2744_s29 }
  0x31   : > { %s2746_s21 = scalar_lea.vmem %s2745_s29, 4096  ;;  %p2747_p6 = scmp.lt.s32.totalorder %s3007_s27, %s2745_s29 }
  0x32   : > { %p2742_p4 = pnand %p2740_p3, %p3015_p10  ;;  %p2748_p9 = scmp.lt.s32.totalorder %s2746_s21, %s2739_s18 }
  0x34   : > { %p2743_p5 = pneg %p2742_p4  ;;  %p2749_p11 = por %p2748_p9, %p2747_p6 }
  0x36   : > { %p2750_p7 = pnand %p2749_p11, %p2743_p5 }
  0x38   : > { %2753 = shalt.err (!%p2750_p7)
}
  0x39   : > { %s2851_s16 = smov 128   ;;  %s2852_s3 = smov 8  }
  0x3a   : > { %2558 = dma.hbm_to_vmem [thread:$0]  (!%p2991_p8), %s3005_s26, 2048, %s3007_s27, %s3009_s23, %s2851_s16, %s2851_s16, %s2852_s3  }
  0x3b   : > { %s3480_s19 = sshll.u32 %s2848_s24, 11  ;;  %s3481_s12 = sld [smem:[#allocation21_spill]] }
  0x3c   : > { %s3482_s29 = sshll.u32 %s2989_s0, 7  ;;  %p2303_p7 = scmp.ge.s32.totalorder %s2848_s24, 1 }
  0x3d   : > { %s565_s21 = scalar_lea.vmem [#allocation7], %s3482_s29  ;;  %p598_p12 = scmp.lt.s32.totalorder %s2848_s24, 3 }
  0x3e   : > { %s572_s10 = sshll.u32 %s565_s21, 4  ;;  %s2542_s2 = smul.u32 192, %s2989_s0  ;;  %s3048_s10 = int_to_ptr.vmem [resolvable:$true] %s572_s10 }
  0x3f   : > { %p3052_p13 = pnand %p2303_p7, %p598_p12  ;;  %s2543_s26 = smul.u32 3072, %s2848_s24 }
  0x40   : > { %s3484_s4 = sld [smem:[#allocation17_spill]]  ;;  %s480_s28 = scalar_lea.sflag [#allocation4], %s2989_s0 }
  0x41   : > { %s3043_s18 = scalar_lea.hbm %s3481_s12, %s3480_s19  ;;  %s483_s19 = scalar_lea.vmem [#allocation3], %s2542_s2 }
  0x42   : > { %s3483_s15 = scalar_select %p3052_p13, 1, 0 }
  0x43   : > { %s490_s20 = sshll.u32 %s483_s19, 4  ;;  %s3062_s20 = int_to_ptr.vmem [resolvable:$true] %s490_s20 }
  0x46   : > { %s3060_s3 = scalar_lea.hbm %s3484_s4, %s2543_s26  ;;  %s2759_s14 = scalar_lea.hbm %s3484_s4, 6144 }
  0x47   : > { %s2754_s29 = scalar_lea.hbm %s3060_s3, 3072  ;;  %p2760_p3 = scmp.lt.s32.totalorder %s3060_s3, %s3484_s4 }
  0x48   : > { %p2755_p0 = scmp.ne.s32.totalorder %s3060_s3, %s2754_s29  ;;  %p2761_p4 = scmp.lt.s32.totalorder %s2759_s14, %s2754_s29 }
  0x4a   : > { %p2757_p1 = pnand %p2755_p0, %p3015_p10  ;;  %p2762_p5 = por %p2761_p4, %p2760_p3 }
  0x4c   : > { %p2758_p2 = pneg %p2757_p1 }
  0x4e   : > { %p2763_p6 = pnand %p2762_p5, %p2758_p2 }
  0x50   : > { %2766 = shalt.err (!%p2763_p6)
}
  0x51   : > { %s2767_s2 = scalar_lea.vmem %s3062_s20, 3072  ;;  %s2853_s16 = smov [#allocation3]  }
  0x52   : > { %p2768_p9 = scmp.ne.s32.totalorder %s3062_s20, %s2767_s2  ;;  %s2772_s19 = sshll.u32 %s2853_s16, 4  ;;  %s2773_s19 = int_to_ptr.vmem [resolvable:$false] %s2772_s19 }
  0x53   : > { %s2774_s21 = scalar_lea.vmem %s2773_s19, 6144  ;;  %p2775_p12 = scmp.lt.s32.totalorder %s3062_s20, %s2773_s19 }
  0x54   : > { %p2770_p11 = pnand %p2768_p9, %p3015_p10  ;;  %p2776_p0 = scmp.lt.s32.totalorder %s2774_s21, %s2767_s2 }
  0x56   : > { %p2771_p7 = pneg %p2770_p11  ;;  %p2777_p1 = por %p2776_p0, %p2775_p12 }
  0x58   : > { %p2778_p13 = pnand %p2777_p1, %p2771_p7 }
  0x5a   : > { %2781 = shalt.err (!%p2778_p13)
}
  0x5b   : > { %s2854_s14 = smov 192   ;;  %s2855_s29 = smov 12  }
  0x5c   : > { %2555 = dma.hbm_to_vmem [thread:$0]  (!%p2991_p8), %s3060_s3, 3072, %s3062_s20, %s480_s28, %s2854_s14, %s2854_s14, %s2855_s29  }
  0x5d   : > { %s2782_s24 = scalar_lea.hbm %s3043_s18, 2048  ;;  %s2787_s2 = scalar_lea.hbm %s3481_s12, 4096 }
  0x5e   : > { %p2783_p2 = scmp.ne.s32.totalorder %s3043_s18, %s2782_s24  ;;  %p2788_p13 = scmp.lt.s32.totalorder %s3043_s18, %s3481_s12 }
  0x5f   : > { %p2789_p5 = scmp.lt.s32.totalorder %s2787_s2, %s2782_s24 }
  0x60   : > { %p2785_p3 = pnand %p2783_p2, %p3015_p10 }
  0x61   : > { %p2790_p6 = por %p2789_p5, %p2788_p13 }
  0x62   : > { %p2786_p4 = pneg %p2785_p3 }
  0x64   : > { %p2791_p9 = pnand %p2790_p6, %p2786_p4 }
  0x66   : > { %2794 = shalt.err (!%p2791_p9)
}
  0x67   : > { %s2795_s0 = scalar_lea.vmem %s3048_s10, 2048  ;;  %s2856_s3 = smov [#allocation7]  }
  0x68   : > { %p2796_p11 = scmp.ne.s32.totalorder %s3048_s10, %s2795_s0  ;;  %s2800_s20 = sshll.u32 %s2856_s3, 4  ;;  %s2801_s20 = int_to_ptr.vmem [resolvable:$false] %s2800_s20 }
  0x69   : > { %s2802_s28 = scalar_lea.vmem %s2801_s20, 4096  ;;  %p2803_p0 = scmp.lt.s32.totalorder %s3048_s10, %s2801_s20 }
  0x6a   : > { %p2798_p7 = pnand %p2796_p11, %p3015_p10  ;;  %p2804_p1 = scmp.lt.s32.totalorder %s2802_s28, %s2795_s0 }
  0x6c   : > { %p2799_p12 = pneg %p2798_p7  ;;  %p2805_p2 = por %p2804_p1, %p2803_p0 }
  0x6e   : > { %p2806_p3 = pnand %p2805_p2, %p2799_p12 }
  0x70   : > { %2809 = shalt.err (!%p2806_p3)
}
  0x71   : > { %s2857_s21 = smov 64   ;;  %s2858_s14 = smov 4  }
  0x72   : > { %2561 = dma.hbm_to_vmem [thread:$0]  (!%p2991_p8), %s3043_s18, 2048, %s3048_s10, %s3009_s23, %s2857_s21, %s2857_s21, %s2858_s14  }
  0x73   : > { %p3485_p10 = scmp.ne.s32.totalorder %s3483_s15, 0 }
  0x74   : > { %s604_s1 = sand.u32 (!%p3485_p10), 1, %s2840_s22   ;;  %p3486_p4 = scmp.ne.s32.totalorder (!%p3485_p10), %s3476_s30, 0 }
  0x75   : > { %602 = sbr.rel (%p3485_p10) target bundleno = 2947 (0xb83), region = 84  ;;  %s605_s24 = scalar_lea.sflag (!%p3485_p10), [#allocation4], %s604_s1 }
  0x76   : > { %s2544_s29 = smul.u32 (!%p3485_p10), 192, %s604_s1 }
  0x78   : > { %s3111_s27 = scalar_lea.vmem (!%p3485_p10), [#allocation3], %s2544_s29 }
  0x7a   : > { %2827 = dma.done.wait (%p3486_p4), %s605_s24, 3072  }
  0x7b   : > { %2829 = vsyncadd (%p3486_p4), %s605_s24, 4294964224  ;;  %s613_s26 = sand.u32 1, %s2967_s25   ;;  %s2304_s17 = sshll.u32 %s604_s1, 7 }
  0x7c   : > { %s614_s10 = scalar_lea.sflag [#allocation6], %s613_s26  ;;  %s3118_s23 = scalar_lea.vmem [#allocation5], %s2304_s17 }
  0x7d   : > { %2831 = dma.done.wait (%p3486_p4), %s614_s10, 4096  }
  0x7e   : > { %2833 = vsyncadd (%p3486_p4), %s614_s10, 4294963200  ;;  %p711_p8 = scmp.lt.s32.totalorder %s2967_s25, 1  ;;  %s3487_s6 = sld [smem:[#allocation19_spill]] }
  0x7f   : > { %s3488_s5 = sld [smem:[#allocation18_spill]]  ;;  %s3170_s26 = scalar_lea.vmem [#allocation7], %s2304_s17 }
  0x80   : > { %s3126_s15 = scalar_select %p711_p8, %s2967_s25, 1 }
  0x81   : > { %s3489_s20 = sld [smem:[#allocation22_spill]]  ;;  %p2309_p13 = scmp.ne.s32.totalorder %s2967_s25, 0 }
  0x82   : > { %s2545_s18 = smul.u32 3, %s3126_s15  ;;  %s2397_s2 = sshll.u32 %s3126_s15, 6 }
  0x83   : > { %s728_s4 = scalar_lea.vmem %s3445_s9, %s3126_s15  ;;  %s2308_s16 = sshll.u32 %s3126_s15, 1 }
  0x84   : > { %s3133_s30 = scalar_lea.vmem %s3487_s6, %s2397_s2  ;;  %s3156_s6 = scalar_lea.vmem %s3447_s11, %s2308_s16 }
  0x85   : > { %s3142_s14 = scalar_lea.vmem %s3488_s5, %s2545_s18  ;;  %s735_s28 = scalar_lea.vmem %s3449_s13, %s3126_s15 }
  0x86   : > { %s3490_s24 = sld [smem:[#allocation23_spill]] }
  0x87   : > { %s738_s5 = scalar_lea.vmem %s3489_s20, %s3126_s15  ;;  %s3491_s2 = sld [smem:[#allocation13_spill]] (!%p2309_p13) }
  0x88   : > { %746 = sbr.rel (%p2309_p13) target bundleno = 315 (0x13b), region = 100  ;;  %s3493_s21 = sld [smem:[#allocation16_spill]] (!%p2309_p13) }
  0x8c   : > { %s741_s12 = scalar_lea.vmem %s3490_s24, %s3126_s15  ;;  %s3492_s24 = sld [smem:[#allocation15_spill]] (!%p2309_p13) }
  0x8d   : > { %v747_v0 = vld [vmem:[%s3491_s2] sm:$0xff]  ;;  %v748_v1 = vld [vmem:[%s3491_s2 + $0x8] sm:$0xff] }
  0x8e   : > { %751 = vadd.xlane.f32.xlu0 %v747_v0  ;;  %v758_v2 = vmul.f32 %v747_v0, %v747_v0  ;;  %v759_v3 = vmul.f32 %v748_v1, %v748_v1  ;;  %v2311_v24 = vld [vmem:[%s3493_s21] ss:$0 sm:$0xff] }
  0x90   : > { %760 = vadd.xlane.f32.xlu1 %v758_v2 }
  0x92   : > { %753 = vadd.xlane.f32.xlu0 %v748_v1  ;;  %v2310_v22 = vld [vmem:[%s3492_s24] ss:$0 sm:$0xff] }
  0x94   : > { %762 = vadd.xlane.f32.xlu1 %v759_v3 }
 0x117   : > { %v752_v4 = vpop.xlane.xlu0 %751 }
 0x118   : > { %v756_v5 = vmul.f32 0.0078125, %v752_v4 }
 0x119   : > { %v761_v6 = vpop.xlane.xlu1 %760 }
 0x11a   : > { %v766_v7 = vmul.f32 %v756_v5, %v756_v5  ;;  %v764_v8 = vmul.f32 0.0078125, %v761_v6  ;;  %v772_v20 = vsub.f32 %v747_v0, %v756_v5 }
 0x11b   : > { %v754_v9 = vpop.xlane.xlu0 %753 }
 0x11c   : > { %v768_v10 = vsub.f32 %v764_v8, %v766_v7  ;;  %v757_v11 = vmul.f32 0.0078125, %v754_v9 }
 0x11d   : > { %v763_v12 = vpop.xlane.xlu1 %762 }
 0x11e   : > { %v770_v13 = vmax.f32 %v768_v10, 0.0  ;;  %v767_v14 = vmul.f32 %v757_v11, %v757_v11  ;;  %v765_v15 = vmul.f32 0.0078125, %v763_v12  ;;  %v773_v26 = vsub.f32 %v748_v1, %v757_v11 }
 0x120   : > { %v774_v16 = vadd.f32 1e-12, %v770_v13  ;;  %v769_v17 = vsub.f32 %v765_v15, %v767_v14 }
 0x122   : > { %2605 = vrsqrt.f32 %v774_v16  ;;  %v771_v18 = vmax.f32 %v769_v17, 0.0 }
 0x124   : > { %v775_v19 = vadd.f32 1e-12, %v771_v18 }
 0x126   : > { %2607 = vrsqrt.f32 %v775_v19 }
 0x12f   : > { %v2606_v21 = vpop.eup %2605 }
 0x130   : > { %v778_v23 = vmul.f32 %v2606_v21, %v772_v20 }
 0x132   : > { %v786_v25 = vmul.f32 %v2310_v22, %v778_v23 }
 0x133   : > { %v2608_v27 = vpop.eup %2607 }
 0x134   : > { %v794_v28 = vadd.f32 %v2311_v24, %v786_v25  ;;  %v779_v29 = vmul.f32 %v2608_v27, %v773_v26 }
 0x136   : > { %796 = vst [vmem:[#allocation2] sm:$0xff] %v794_v28  ;;  %v787_v30 = vmul.f32 %v2310_v22, %v779_v29 }
 0x138   : > { %v795_v31 = vadd.f32 %v2311_v24, %v787_v30 }
 0x13a   : > { %797 = vst [vmem:[#allocation2 + $0x8] sm:$0xff] %v795_v31 }
 0x13b PF: > { %v2614_v32 = vld [vmem:[%s3111_s27 + $0xac] ss:$12 sps:$4 sm:$0xff]   ;;  %v2616_v33 = vld [vmem:[%s3111_s27 + $0xa8] ss:$12 sps:$4 sm:$0xff]   ;;  %v2859_v34 = vmov 0   ;;  %v2860_v35 = vmov 0.0   ;;  %v835_v61 = vlaneseq  ;;  %s3495_s0 = scalar_lea.vmem %s3443_s7, %s3126_s15  ;;  %s3496_s20 = scalar_lea.vmem %s3444_s8, %s3126_s15 }
 0x13c   : > { %1010 = vmatprep.mubr.bf16.mxu0 %v2859_v34  ;;  %2454 = vmatprep.subr.bf16.mxu1 %v2860_v35  ;;  %v2617_v36 = vld [vmem:[%s3111_s27 + $0x94] ss:$12 sps:$4 sm:$0xff]   ;;  %v2619_v37 = vld [vmem:[%s3111_s27 + $0x90] ss:$12 sps:$4 sm:$0xff]   ;;  %v2622_v39 = vld [vmem:[%s3111_s27 + $0x78] ss:$12 sps:$4 sm:$0xff]  }
 0x13d   : > { %978 = vmatprep.subr.bf16.mxu0 %v2614_v32  ;;  %v2620_v38 = vld [vmem:[%s3111_s27 + $0x7c] ss:$12 sps:$4 sm:$0xff]   ;;  %v2623_v40 = vld [vmem:[%s3111_s27 + $0x64] ss:$12 sps:$4 sm:$0xff]   ;;  %v2625_v41 = vld [vmem:[%s3111_s27 + $0x60] ss:$12 sps:$4 sm:$0xff]  }
 0x13e   : > { %979 = vmatpush1.bf16.msra.mxu0 %v2616_v33  ;;  %v2626_v42 = vld [vmem:[%s3111_s27 + $0x4c] ss:$12 sps:$4 sm:$0xff]   ;;  %v2638_v43 = vld [vmem:[%s3111_s27 + $0xb0] ss:$12 sps:$4 sm:$0xff]   ;;  %v2628_v45 = vld [vmem:[%s3111_s27 + $0x48] ss:$12 sps:$4 sm:$0xff]  }
 0x13f   : > { %980 = vmatprep.subr.bf16.mxu0 %v2617_v36  ;;  %2455 = vmatpush3.bf16.msra.mxu1 %v2638_v43  ;;  %v2639_v44 = vld [vmem:[%s3111_s27 + $0x98] ss:$12 sps:$4 sm:$0xff]   ;;  %v2629_v46 = vld [vmem:[%s3111_s27 + $0x34] ss:$12 sps:$4 sm:$0xff]   ;;  %v2631_v48 = vld [vmem:[%s3111_s27 + $0x30] ss:$12 sps:$4 sm:$0xff]  }
 0x140   : > { %2456 = vmatprep.subr.bf16.mxu1 %v2860_v35  ;;  %v2640_v47 = vld [vmem:[%s3111_s27 + $0x80] ss:$12 sps:$4 sm:$0xff]   ;;  %v2632_v49 = vld [vmem:[%s3111_s27 + $0x1c] ss:$12 sps:$4 sm:$0xff]   ;;  %v2634_v51 = vld [vmem:[%s3111_s27 + $0x18] ss:$12 sps:$4 sm:$0xff]  }
 0x141   : > { %v2641_v50 = vld [vmem:[%s3111_s27 + $0x68] ss:$12 sps:$4 sm:$0xff]   ;;  %v2635_v52 = vld [vmem:[%s3111_s27 + $0x4] ss:$12 sps:$4 sm:$0xff]   ;;  %v2637_v54 = vld [vmem:[%s3111_s27] ss:$12 sps:$4 sm:$0xff]  }
 0x142   : > { %981 = vmatpush1.bf16.msra.mxu0 %v2619_v37  ;;  %v2642_v53 = vld [vmem:[%s3111_s27 + $0x50] ss:$12 sps:$4 sm:$0xff]   ;;  %v2643_v57 = vld [vmem:[%s3111_s27 + $0x38] ss:$12 sps:$4 sm:$0xff]   ;;  %v2644_v59 = vld [vmem:[%s3111_s27 + $0x20] ss:$12 sps:$4 sm:$0xff]  }
 0x143   : > { %982 = vmatprep.subr.bf16.mxu0 %v2620_v38  ;;  %2457 = vmatpush3.bf16.msra.mxu1 %v2639_v44  ;;  %v3211_v55 = vld [vmem:[#allocation2] sm:$0xff]  ;;  %v3213_v56 = vld [vmem:[#allocation2 + $0x8] sm:$0xff]  ;;  %vm2861_vm0 = vmmov 0   ;;  %v3232_v62 = vshrl.u32 %v835_v61, 7  ;;  %vm1070_vm1 = vcmask 523264   ;;  %vm1207_vm2 = vcmask 1043456  }
 0x144   : > { %2458 = vmatprep.subr.bf16.mxu1 %v2860_v35  ;;  %v800_v58 = vpack.c.bf16 %v3213_v56, %v3211_v55  ;;  %v2645_v60 = vld [vmem:[%s3111_s27 + $0x8] ss:$12 sps:$4 sm:$0xff]   ;;  %2470 = vmatprep.mubr.msk.bf16.mxu1 %vm2861_vm0, %v2860_v35  ;;  %v833_v0 = vld [vmem:[%s3142_s14] sm:$0x7]  ;;  %s3494_s1 = sld [smem:[#allocation14_spill]]  ;;  %vm1179_vm3 = vcmask 64512  }
 0x145   : > { %v841_v63 = vsub.s32 1, %v3232_v62  ;;  %v837_v3 = vsub.s32 0, %v3232_v62  ;;  %v845_v18 = vsub.s32 2, %v3232_v62  ;;  %s2862_s16 = smov 64   ;;  %p2392_p5 = scmp.ne.s32.totalorder %s2967_s25, 1 }
 0x146   : > { %983 = vmatpush1.bf16.msra.mxu0 %v2622_v39  ;;  %s3499_s10 = sld [smem:[#allocation24_spill]] (!%p2392_p5) }
 0x147   : > { %984 = vmatprep.subr.bf16.mxu0 %v2623_v40  ;;  %2459 = vmatpush3.bf16.msra.mxu1 %v2640_v47  ;;  %v842_v1 = vrot.slane %v833_v0, %v841_v63  ;;  %v838_v7 = vrot.slane %v833_v0, %v837_v3  ;;  %v846_v19 = vrot.slane %v833_v0, %v845_v18 }
 0x148   : > { %2460 = vmatprep.subr.bf16.mxu1 %v2860_v35 }
 0x14a   : > { %985 = vmatpush1.bf16.msra.mxu0 %v2625_v41  ;;  %v3260_v29 = vld [vmem:[%s3494_s1] ss:$0 sm:$0xff]  ;;  %v3267_v39 = vld [vmem:[%s3494_s1 + $0x1] ss:$0 sm:$0xff] }
 0x14b   : > { %986 = vmatprep.subr.bf16.mxu0 %v2626_v42  ;;  %2461 = vmatpush3.bf16.msra.mxu1 %v2641_v50 }
 0x14c   : > { %2462 = vmatprep.subr.bf16.mxu1 %v2860_v35 }
 0x14e   : > { %987 = vmatpush1.bf16.msra.mxu0 %v2628_v45 }
 0x14f   : > { %988 = vmatprep.subr.bf16.mxu0 %v2629_v46  ;;  %2463 = vmatpush3.bf16.msra.mxu1 %v2642_v53 }
 0x150   : > { %2464 = vmatprep.subr.bf16.mxu1 %v2860_v35 }
 0x152   : > { %989 = vmatpush1.bf16.msra.mxu0 %v2631_v48 }
 0x153   : > { %990 = vmatprep.subr.bf16.mxu0 %v2632_v49  ;;  %2465 = vmatpush3.bf16.msra.mxu1 %v2643_v57 }
 0x154   : > { %2466 = vmatprep.subr.bf16.mxu1 %v2860_v35 }
 0x156   : > { %991 = vmatpush1.bf16.msra.mxu0 %v2634_v51 }
 0x157   : > { %992 = vmatprep.subr.bf16.mxu0 %v2635_v52  ;;  %2467 = vmatpush3.bf16.msra.mxu1 %v2644_v59 }
 0x158   : > { %2468 = vmatprep.subr.bf16.mxu1 %v2860_v35 }
 0x15a   : > { %993 = vmatpush1.bf16.msra.mxu0 %v2637_v54 }
 0x15b   : > { %2498 = vmatprep.subr.bf16.mxu0 %v2860_v35  ;;  %2469 = vmatpush3.bf16.msra.mxu1 %v2645_v60 }
 0x15c   : > { %2474 = vmatprep.subr.bf16.mxu1 %v2860_v35 }
 0x15d   : > { %1011 = vmatmul.mubr.bf16.vlgmr.msra.gmra.mxu0 %v800_v58 }
 0x15e   : > { %2500 = vmatprep.mubr.msk.bf16.mxu0 %vm2861_vm0, %v2860_v35  ;;  %2471 = vmatmul.mubr.bf16.vlgmr.msra.gmra.mxu1 %v800_v58 }
 0x15f   : > { %2476 = vmatprep.mubr.msk.bf16.mxu1 %vm2861_vm0, %v2860_v35 }
 0x21d   : > { %v1012_v2 = vpop.f32.mrf.mxu0 }
 0x21e   : > { %v1013_v12 = vadd.f32 %v1012_v2, %v838_v7  ;;  %v1055_v20 = vpop.f32.mrf.mxu1 }
 0x21f   : > { %v1014_v4 = vpop.f32.mrf.mxu0  ;;  %v1056_v21 = vadd.f32 %v1055_v20, %v846_v19 }
 0x220   : > { %v1015_v5 = vadd.f32 %v1014_v4, %v842_v1  ;;  %v1064_v14 = vpack.c.bf16 %v1013_v12, %v1013_v12  ;;  %v2472_v22 = vpop.f32.mrf.mxu1 }
 0x221   : > { %v1016_v6 = vpop.f32.mrf.mxu0  ;;  %v3252_v23 = vpack.c.bf16 %v1056_v21, %v1056_v21 }
 0x222   : > { %v1066_v8 = vpack.c.bf16 %v1015_v5, %v1015_v5  ;;  %v1017_v16 = vadd.f32 %v1016_v6, %v838_v7  ;;  %v1058_v24 = vpop.f32.mrf.mxu1 }
 0x223   : > { %v1018_v9 = vpop.f32.mrf.mxu0  ;;  %v1209_v25 = vsel %vm1207_vm2, %v3252_v23, 0  ;;  %v1059_v26 = vadd.f32 %v1058_v24, %v846_v19 }
 0x224   : > { %v1075_v10 = vsel %vm1070_vm1, %v1066_v8, 0  ;;  %v1019_v11 = vadd.f32 %v1018_v9, %v842_v1  ;;  %v1065_v17 = vpack.c.bf16 %v1017_v16, %v1017_v16  ;;  %v2473_v27 = vpop.f32.mrf.mxu1 }
 0x225   : > { %2475 = vmatpush3.bf16.xpose.msra.mxu1 %v1075_v10  ;;  %v1069_v0 = vpack.c.bf16 %v1059_v26, %v1059_v26 }
 0x226   : > { %2480 = vmatprep.subr.bf16.mxu1 %v2860_v35  ;;  %v1067_v13 = vpack.c.bf16 %v1019_v11, %v1019_v11 }
 0x227   : > { %v1255_v4 = vsel %vm1207_vm2, %v1069_v0, 0 }
 0x228   : > { %v1121_v15 = vsel %vm1070_vm1, %v1067_v13, 0 }
 0x22c   : > { %2477 = vmatmul.mubr.msk.bf16.vlgmr.msra.gmra.mxu1 %vm1070_vm1, %v1064_v14 }
 0x22d   : > { %2481 = vmatpush3.bf16.xpose.msra.mxu1 %v1121_v15  ;;  %2482 = vmatprep.mubr.msk.bf16.mxu1 %vm2861_vm0, %v2860_v35 }
 0x22e   : > { %2486 = vmatprep.subr.bf16.mxu1 %v2860_v35 }
 0x234   : > { %2483 = vmatmul.mubr.msk.bf16.vlgmr.msra.gmra.mxu1 %vm1070_vm1, %v1065_v17 }
 0x235   : > { %2488 = vmatprep.mubr.msk.bf16.mxu1 %vm2861_vm0, %v2860_v35  ;;  %2487 = vmatpush3.bf16.msra.mxu1 %v1209_v25 }
 0x236   : > { %2492 = vmatprep.subr.bf16.mxu1 %v2860_v35 }
 0x2ec   : > { %v1111_v28 = vpop.f32.mrf.mxu1 }
 0x2ed   : > { %v1163_v30 = vmul.f32 0.125, %v1111_v28 }
 0x2ee   : > { %v2478_v31 = vpop.f32.mrf.mxu1 }
 0x2ef   : > { %v1177_v32 = vadd.f32 %v3260_v29, %v1163_v30 }
 0x2f0   : > { %v1114_v33 = vpop.f32.mrf.mxu1 }
 0x2f1   : > { %v1180_v36 = vsel %vm1179_vm3, %v1177_v32, -inf }
 0x2f2   : > { %1181 = vmax.xlane.f32.xlu0 %v1180_v36  ;;  %v2479_v37 = vpop.f32.mrf.mxu1 }
 0x2f4   : > { %v1157_v38 = vpop.f32.mrf.mxu1 }
 0x2f5   : > { %v1164_v40 = vmul.f32 0.125, %v1157_v38 }
 0x2f6   : > { %v2484_v41 = vpop.f32.mrf.mxu1 }
 0x2f7   : > { %v1178_v42 = vadd.f32 %v3267_v39, %v1164_v40 }
 0x2f8   : > { %v1160_v43 = vpop.f32.mrf.mxu1 }
 0x2f9   : > { %v1183_v44 = vsel %vm1179_vm3, %v1178_v42, -inf }
 0x2fa   : > { %1184 = vmax.xlane.f32.xlu0 %v1183_v44  ;;  %v2485_v45 = vpop.f32.mrf.mxu1 }
 0x310   : > { %1301 = vrot.lane.b32.xlu0 %v1066_v8, %s2862_s16 }
 0x37b   : > { %v1182_v46 = vpop.xlane.xlu0 %1181 }
 0x37c   : > { %v1186_v47 = vsub.f32 %v1177_v32, %v1182_v46 }
 0x37e   : > { %v1188_v48 = vmul.f32 1.442695, %v1186_v47 }
 0x380   : > { %2694 = vpow2.f32 %v1188_v48 }
 0x383   : > { %v1185_v49 = vpop.xlane.xlu0 %1184 }
 0x384   : > { %v1187_v54 = vsub.f32 %v1178_v42, %v1185_v49 }
 0x386   : > { %v1190_v57 = vmul.f32 1.442695, %v1187_v54 }
 0x387   : > { %v1302_v50 = vpop.permute.xlu0 %1301 }
 0x388   : > { %v1307_v51 = vsel %vm1070_vm1, %v1302_v50, 0  ;;  %2696 = vpow2.f32 %v1190_v57 }
 0x389   : > { %2499 = vmatpush3.bf16.xpose.msra.mxu0 %v1307_v51 }
 0x38a   : > { %2510 = vmatprep.subr.bf16.mxu0 %v2860_v35 }
 0x38d   : > { %v2695_v52 = vpop.eup %2694 }
 0x38e   : > { %v1192_v53 = vsel %vm1179_vm3, %v2695_v52, 0.0 }
 0x38f   : > { %1193 = vadd.xlane.f32.xlu1 %v1192_v53 }
 0x395   : > { %v2697_v58 = vpop.eup %2696 }
 0x396   : > { %v1195_v59 = vsel %vm1179_vm3, %v2697_v58, 0.0 }
 0x3a0   : > { %1353 = vrot.lane.b32.xlu1 %v1067_v13, %s2862_s16 }
 0x3c4   : > { %1196 = vadd.xlane.f32.xlu1 %v1195_v59 }
 0x3d5   : > { %1298 = vrot.lane.b32.xlu1 %v1064_v14, %s2862_s16 }
 0x3d9   : > { %1350 = vrot.lane.b32.xlu1 %v1065_v17, %s2862_s16 }
 0x418   : > { %v1194_v60 = vpop.xlane.xlu1 %1193 }
 0x419   : > { %2698 = vrcp.f32 %v1194_v60 }
 0x41c   : > { %v1354_v5 = vpop.permute.xlu1 %1353 }
 0x41d   : > { %v1359_v11 = vsel %vm1070_vm1, %v1354_v5, 0  ;;  %v2652_v5 = vld [vmem:[%s3133_s30 + $0x8] sm:$0xff]  }
 0x426   : > { %v2699_v61 = vpop.eup %2698 }
 0x427   : > { %v1200_v1 = vmul.f32 %v2699_v61, %v2695_v52  ;;  %v2646_v61 = vld [vmem:[%s3133_s30 + $0x38] sm:$0xff]  }
 0x429   : > { %v1202_v2 = vpack.c.bf16 %v1200_v1, %v1200_v1  ;;  %v2648_v1 = vld [vmem:[%s3133_s30 + $0x28] sm:$0xff]  }
 0x42b   : > { %2489 = vmatmul.mubr.msk.bf16.vlgmr.msra.gmra.mxu1 %vm1179_vm3, %v1202_v2  ;;  %v2649_v2 = vld [vmem:[%s3133_s30 + $0x20] sm:$0xff]  }
 0x42c   : > { %2493 = vmatpush3.bf16.msra.mxu1 %v1255_v4  ;;  %2494 = vmatprep.mubr.msk.bf16.mxu1 %vm2861_vm0, %v2860_v35  ;;  %v2650_v4 = vld [vmem:[%s3133_s30 + $0x18] sm:$0xff]  }
 0x42d   : > { %2504 = vmatprep.subr.bf16.mxu1 %v2860_v35 }
 0x44d   : > { %v1197_v6 = vpop.xlane.xlu1 %1196 }
 0x44e   : > { %2700 = vrcp.f32 %v1197_v6 }
 0x451   : > { %v1299_v7 = vpop.permute.xlu1 %1298 }
 0x452   : > { %2501 = vmatmul.mubr.msk.bf16.vlgmr.msra.gmra.mxu0 %vm1070_vm1, %v1299_v7  ;;  %v2653_v7 = vld [vmem:[%s3133_s30] sm:$0xff]  }
 0x453   : > { %2512 = vmatprep.mubr.msk.bf16.mxu0 %vm2861_vm0, %v2860_v35 }
 0x455   : > { %v1351_v12 = vpop.permute.xlu1 %1350 }
 0x45b   : > { %v2701_v8 = vpop.eup %2700 }
 0x45c   : > { %v1201_v9 = vmul.f32 %v2701_v8, %v2697_v58 }
 0x45e   : > { %v1203_v10 = vpack.c.bf16 %v1201_v9, %v1201_v9 }
 0x460   : > { %2495 = vmatmul.mubr.msk.bf16.vlgmr.msra.gmra.mxu1 %vm1179_vm3, %v1203_v10 }
 0x461   : > { %2505 = vmatpush3.bf16.xpose.msra.mxu1 %v1359_v11  ;;  %2506 = vmatprep.mubr.msk.bf16.mxu1 %vm2861_vm0, %v2860_v35 }
 0x462   : > { %2516 = vmatprep.subr.bf16.mxu1 %v2860_v35 }
 0x468   : > { %2507 = vmatmul.mubr.msk.bf16.vlgmr.msra.gmra.mxu1 %vm1070_vm1, %v1351_v12 }
 0x469   : > { %2518 = vmatprep.mubr.msk.bf16.mxu1 %vm2861_vm0, %v2860_v35 }
 0x4eb   : > { %v3295_v13 = vpop.f32.mrf.mxu1 }
 0x4ed   : > { %v2490_v14 = vpop.f32.mrf.mxu1 }
 0x4ef   : > { %v1248_v15 = vpop.f32.mrf.mxu1 }
 0x4f1   : > { %v2491_v16 = vpop.f32.mrf.mxu1 }
 0x512   : > { %v1343_v17 = vpop.f32.mrf.mxu0 }
 0x513   : > { %v1401_v18 = vmul.f32 0.125, %v1343_v17 }
 0x514   : > { %v2502_v19 = vpop.f32.mrf.mxu0 }
 0x515   : > { %v1403_v20 = vadd.f32 %v3260_v29, %v1401_v18 }
 0x516   : > { %v1346_v21 = vpop.f32.mrf.mxu0 }
 0x517   : > { %v1405_v22 = vsel %vm1179_vm3, %v1403_v20, -inf }
 0x518   : > { %1406 = vmax.xlane.f32.xlu0 %v1405_v22  ;;  %v2503_v24 = vpop.f32.mrf.mxu0  ;;  %v2346_v22 = vld [vmem:[%s3495_s0] ss:$0 sm:$0xff] }
 0x520   : > { %v3299_v25 = vpop.f32.mrf.mxu1 }
 0x522   : > { %v2496_v26 = vpop.f32.mrf.mxu1 }
 0x524   : > { %v1294_v27 = vpop.f32.mrf.mxu1 }
 0x526   : > { %v2497_v28 = vpop.f32.mrf.mxu1 }
 0x528   : > { %v1395_v30 = vpop.f32.mrf.mxu1 }
 0x529   : > { %v1402_v31 = vmul.f32 0.125, %v1395_v30 }
 0x52a   : > { %v2508_v32 = vpop.f32.mrf.mxu1 }
 0x52b   : > { %v1404_v33 = vadd.f32 %v3267_v39, %v1402_v31 }
 0x52c   : > { %v1398_v36 = vpop.f32.mrf.mxu1 }
 0x52d   : > { %v1408_v37 = vsel %vm1179_vm3, %v1404_v33, -inf  ;;  %v2654_v36 = vld [vmem:[%s3118_s23 + $0x70] ss:$8 sps:$4 sm:$0xff]  }
 0x52e   : > { %1409 = vmax.xlane.f32.xlu1 %v1408_v37  ;;  %v2509_v29 = vpop.f32.mrf.mxu1  ;;  %v2659_v37 = vld [vmem:[%s3118_s23 + $0x64] ss:$8 sps:$4 sm:$0xff]  }
 0x52f   : > { %v2657_v29 = vld [vmem:[%s3118_s23 + $0x60] ss:$8 sps:$4 sm:$0xff]  }
 0x53f   : > { %1479 = vrot.lane.b32.xlu1 %v1069_v0, %s2862_s16  ;;  %v2647_v0 = vld [vmem:[%s3133_s30 + $0x30] sm:$0xff]  }
 0x5a1   : > { %v1407_v38 = vpop.xlane.xlu0 %1406 }
 0x5a2   : > { %v1411_v40 = vsub.f32 %v1403_v20, %v1407_v38  ;;  %v2662_v38 = vld [vmem:[%s3118_s23 + $0x54] ss:$8 sps:$4 sm:$0xff]  }
 0x5a4   : > { %v1413_v41 = vmul.f32 1.442695, %v1411_v40  ;;  %v2663_v40 = vld [vmem:[%s3118_s23 + $0x40] ss:$8 sps:$4 sm:$0xff]  }
 0x5a6   : > { %2702 = vpow2.f32 %v1413_v41  ;;  %v2665_v41 = vld [vmem:[%s3118_s23 + $0x44] ss:$8 sps:$4 sm:$0xff]  }
 0x5b3   : > { %v2703_v42 = vpop.eup %2702 }
 0x5b4   : > { %v1417_v43 = vsel %vm1179_vm3, %v2703_v42, 0.0 }
 0x5b5   : > { %1418 = vadd.xlane.f32.xlu0 %v1417_v43  ;;  %v2666_v43 = vld [vmem:[%s3118_s23 + $0x30] ss:$8 sps:$4 sm:$0xff]  }
 0x5b7   : > { %v1410_v44 = vpop.xlane.xlu1 %1409 }
 0x5b8   : > { %v1412_v45 = vsub.f32 %v1404_v33, %v1410_v44  ;;  %v2671_v44 = vld [vmem:[%s3118_s23 + $0x24] ss:$8 sps:$4 sm:$0xff]  }
 0x5ba   : > { %v1415_v46 = vmul.f32 1.442695, %v1412_v45  ;;  %v2669_v45 = vld [vmem:[%s3118_s23 + $0x20] ss:$8 sps:$4 sm:$0xff]  }
 0x5bb   : > { %v1480_v47 = vpop.permute.xlu1 %1479 }
 0x5bc   : > { %2704 = vpow2.f32 %v1415_v46  ;;  %v1485_v39 = vsel %vm1207_vm2, %v1480_v47, 0  ;;  %v2674_v46 = vld [vmem:[%s3118_s23 + $0x14] ss:$8 sps:$4 sm:$0xff]   ;;  %v2672_v47 = vld [vmem:[%s3118_s23 + $0x10] ss:$8 sps:$4 sm:$0xff]  }
 0x5bd   : > { %2517 = vmatpush3.bf16.msra.mxu1 %v1485_v39  ;;  %v2677_v39 = vld [vmem:[%s3118_s23 + $0x4] ss:$8 sps:$4 sm:$0xff]  }
 0x5c9   : > { %v2705_v48 = vpop.eup %2704 }
 0x5ca   : > { %v1420_v49 = vsel %vm1179_vm3, %v2705_v48, 0.0 }
 0x5cb   : > { %1421 = vadd.xlane.f32.xlu0 %v1420_v49 }
 0x5e1   : > { %1430 = vrot.lane.b32.xlu0 %v3252_v23, %s2862_s16 }
 0x63e   : > { %v1419_v50 = vpop.xlane.xlu0 %1418 }
 0x63f   : > { %2706 = vrcp.f32 %v1419_v50 }
 0x64c   : > { %v2707_v51 = vpop.eup %2706 }
 0x64d   : > { %v1425_v53 = vmul.f32 %v2707_v51, %v2703_v42  ;;  %v2668_v42 = vld [vmem:[%s3118_s23 + $0x34] ss:$8 sps:$4 sm:$0xff]  }
 0x64f   : > { %v1427_v58 = vpack.c.bf16 %v1425_v53, %v1425_v53 }
 0x654   : > { %v1422_v52 = vpop.xlane.xlu0 %1421 }
 0x655   : > { %2708 = vrcp.f32 %v1422_v52 }
 0x658   : > { %v1431_v54 = vpop.permute.xlu0 %1430 }
 0x659   : > { %v1436_v57 = vsel %vm1207_vm2, %v1431_v54, 0 }
 0x65a   : > { %2511 = vmatpush3.bf16.msra.mxu0 %v1436_v57 }
 0x65b   : > { %2522 = vmatprep.subr.bf16.mxu0 %v2860_v35 }
 0x65d   : > { %2513 = vmatmul.mubr.msk.bf16.vlgmr.msra.gmra.mxu0 %vm1179_vm3, %v1427_v58 }
 0x65e   : > { %2538 = vmatprep.mubr.msk.bf16.mxu0 %vm2861_vm0, %v2860_v35  ;;  %2523 = vmatpush3.bf16.msra.mxu0 %v2646_v61 }
 0x65f   : > { %2524 = vmatprep.subr.bf16.mxu0 %v2860_v35 }
 0x662   : > { %v2709_v23 = vpop.eup %2708  ;;  %2525 = vmatpush3.bf16.msra.mxu0 %v2647_v0 }
 0x663   : > { %v1426_v59 = vmul.f32 %v2709_v23, %v2705_v48  ;;  %2526 = vmatprep.subr.bf16.mxu0 %v2860_v35  ;;  %v2675_v48 = vld [vmem:[%s3118_s23] ss:$8 sps:$4 sm:$0xff]  }
 0x665   : > { %v1428_v60 = vpack.c.bf16 %v1426_v59, %v1426_v59 }
 0x666   : > { %2527 = vmatpush3.bf16.msra.mxu0 %v2648_v1 }
 0x667   : > { %2519 = vmatmul.mubr.msk.bf16.vlgmr.msra.gmra.mxu1 %vm1179_vm3, %v1428_v60  ;;  %2528 = vmatprep.subr.bf16.mxu0 %v2860_v35 }
 0x668   : > { %1840 = vmatprep.mubr.bf16.mxu1 %v2859_v34  ;;  %v2651_v34 = vld [vmem:[%s3133_s30 + $0x10] sm:$0xff]  }
 0x66a   : > { %2529 = vmatpush3.bf16.msra.mxu0 %v2649_v2 }
 0x66b   : > { %2530 = vmatprep.subr.bf16.mxu0 %v2860_v35 }
 0x66e   : > { %2531 = vmatpush3.bf16.msra.mxu0 %v2650_v4 }
 0x66f   : > { %2532 = vmatprep.subr.bf16.mxu0 %v2860_v35 }
 0x672   : > { %2533 = vmatpush3.bf16.msra.mxu0 %v2651_v34 }
 0x673   : > { %2534 = vmatprep.subr.bf16.mxu0 %v2860_v35 }
 0x676   : > { %2535 = vmatpush3.bf16.msra.mxu0 %v2652_v5 }
 0x677   : > { %2536 = vmatprep.subr.bf16.mxu0 %v2860_v35 }
 0x67a   : > { %2537 = vmatpush3.bf16.msra.mxu0 %v2653_v7  ;;  %v2355_v7 = vld [vmem:[%s3496_s20] ss:$0 sm:$0xff] }
 0x71d   : > { %v1472_v6 = vpop.f32.mrf.mxu0 }
 0x71f   : > { %v2514_v8 = vpop.f32.mrf.mxu0 }
 0x721   : > { %v1475_v9 = vpop.f32.mrf.mxu0 }
 0x723   : > { %v2515_v10 = vpop.f32.mrf.mxu0 }
 0x727   : > { %v1521_v11 = vpop.f32.mrf.mxu1 }
 0x728   : > { %v2609_v12 = vpack.i.bf16 %v1521_v11, %v1472_v6 }
 0x729   : > { %v2520_v14 = vpop.f32.mrf.mxu1 }
 0x72a   : > { %2610 = vrot.lane.b32.xlu1 %v2609_v12, %s2862_s16  ;;  %v2356_v12 = vld [vmem:[%s728_s4] ss:$0 sm:$0xff] }
 0x72b   : > { %v1524_v15 = vpop.f32.mrf.mxu1 }
 0x72d   : > { %v2521_v16 = vpop.f32.mrf.mxu1 }
 0x79c   : > { %v2611_v17 = vpop.permute.xlu1 %2610 }
 0x79d   : > { %v2613_v18 = vunpack.i.h.bf16 %v2611_v17  ;;  %v2612_v19 = vunpack.i.l.bf16 %v2611_v17 }
 0x79f   : > { %v1536_v35 = vsel %vm1070_vm1, %v3299_v25, %v2613_v18  ;;  %v1535_v20 = vsel %vm1070_vm1, %v3295_v13, %v2612_v19  ;;  %v2678_v18 = vld [vmem:[%s3170_s26 + $0x78] sm:$0xff]  }
 0x7a0   : > { %v1537_v21 = vpack.c.bf16 %v1536_v35, %v1535_v20  ;;  %v2679_v19 = vld [vmem:[%s3170_s26 + $0x38] sm:$0xff]   ;;  %2432 = vmatprep.subr.bf16.mxu0 %v2678_v18  ;;  %v2680_v35 = vld [vmem:[%s3170_s26 + $0x70] sm:$0xff]  }
 0x7a1   : > { %v2681_v20 = vld [vmem:[%s3170_s26 + $0x30] sm:$0xff]  }
 0x7a2   : > { %2539 = vmatmul.mubr.bf16.vlgmr.msra.gmra.mxu0 %v1537_v21  ;;  %v2682_v21 = vld [vmem:[%s3170_s26 + $0x68] sm:$0xff]  }
 0x7a3   : > { %2433 = vmatpush3.bf16.msra.mxu0 %v2679_v19 }
 0x7a4   : > { %2434 = vmatprep.subr.bf16.mxu0 %v2680_v35 }
 0x7a7   : > { %2435 = vmatpush3.bf16.msra.mxu0 %v2681_v20 }
 0x7a8   : > { %2436 = vmatprep.subr.bf16.mxu0 %v2682_v21  ;;  %v2373_v21 = vld [vmem:[%s735_s28] ss:$0 sm:$0xff] }
 0x862   : > { %v1643_v24 = vpop.f32.mrf.mxu0 }
 0x863   : > { %v1644_v26 = vadd.f32 %v2346_v22, %v1643_v24  ;;  %v2684_v24 = vld [vmem:[%s3170_s26 + $0x60] sm:$0xff]  }
 0x864   : > { %v2540_v27 = vpop.f32.mrf.mxu0 }
 0x865   : > { %v3342_v28 = vadd.f32 %v1644_v26, %v3211_v55  ;;  %v2656_v55 = vld [vmem:[%s3118_s23 + $0x74] ss:$8 sps:$4 sm:$0xff]   ;;  %v2685_v26 = vld [vmem:[%s3170_s26 + $0x20] sm:$0xff]  }
 0x866   : > { %v1646_v25 = vpop.f32.mrf.mxu0  ;;  %1808 = vmatprep.subr.bf16.mxu1 %v2656_v55  ;;  %v2686_v27 = vld [vmem:[%s3170_s26 + $0x58] sm:$0xff]   ;;  %v1716_v55 = vld [vmem:[%s3156_s6] sm:$0x3] }
 0x867   : > { %v1647_v30 = vadd.f32 %v2346_v22, %v1646_v25  ;;  %1654 = vadd.xlane.f32.xlu1 %v3342_v28  ;;  %v1661_v13 = vmul.f32 %v3342_v28, %v3342_v28  ;;  %1809 = vmatpush1.bf16.msra.mxu1 %v2654_v36  ;;  %v2683_v22 = vld [vmem:[%s3170_s26 + $0x28] sm:$0xff]   ;;  %v2688_v25 = vld [vmem:[%s3170_s26 + $0x50] sm:$0xff]   ;;  %v1721_v36 = vrot.slane %v1716_v55, %v837_v3 }
 0x868   : > { %v2541_v31 = vpop.f32.mrf.mxu0  ;;  %1810 = vmatprep.subr.bf16.mxu1 %v2659_v37  ;;  %2437 = vmatpush3.bf16.msra.mxu0 %v2683_v22  ;;  %v1725_v37 = vrot.slane %v1716_v55, %v841_v63 }
 0x869   : > { %1663 = vadd.xlane.f32.xlu0 %v1661_v13  ;;  %v1651_v32 = vadd.f32 %v1647_v30, %v3213_v56  ;;  %v2660_v56 = vld [vmem:[%s3118_s23 + $0x50] ss:$8 sps:$4 sm:$0xff]   ;;  %2438 = vmatprep.subr.bf16.mxu0 %v2684_v24  ;;  %v2690_v13 = vld [vmem:[%s3170_s26 + $0x48] sm:$0xff]  }
 0x86a   : > { %v2689_v30 = vld [vmem:[%s3170_s26 + $0x10] sm:$0xff]   ;;  %v2691_v31 = vld [vmem:[%s3170_s26 + $0x8] sm:$0xff]  }
 0x86b   : > { %v1662_v33 = vmul.f32 %v1651_v32, %v1651_v32  ;;  %1811 = vmatpush1.bf16.msra.mxu1 %v2657_v29 }
 0x86c   : > { %1812 = vmatprep.subr.bf16.mxu1 %v2662_v38  ;;  %2439 = vmatpush3.bf16.msra.mxu0 %v2685_v26 }
 0x86d   : > { %1656 = vadd.xlane.f32.xlu0 %v1651_v32  ;;  %2440 = vmatprep.subr.bf16.mxu0 %v2686_v27 }
 0x86f   : > { %1813 = vmatpush1.bf16.msra.mxu1 %v2660_v56 }
 0x870   : > { %1814 = vmatprep.subr.bf16.mxu1 %v2665_v41 }
 0x871   : > { %1665 = vadd.xlane.f32.xlu0 %v1662_v33  ;;  %v2693_v33 = vld [vmem:[%s3170_s26] sm:$0xff]  }
 0x873   : > { %1815 = vmatpush1.bf16.msra.mxu1 %v2663_v40 }
 0x874   : > { %1816 = vmatprep.subr.bf16.mxu1 %v2668_v42 }
 0x877   : > { %1817 = vmatpush1.bf16.msra.mxu1 %v2666_v43 }
 0x878   : > { %1818 = vmatprep.subr.bf16.mxu1 %v2671_v44 }
 0x87b   : > { %1819 = vmatpush1.bf16.msra.mxu1 %v2669_v45 }
 0x87c   : > { %1820 = vmatprep.subr.bf16.mxu1 %v2674_v46 }
 0x87f   : > { %1821 = vmatpush1.bf16.msra.mxu1 %v2672_v47 }
 0x880   : > { %1822 = vmatprep.subr.bf16.mxu1 %v2677_v39 }
 0x883   : > { %1823 = vmatpush1.bf16.msra.mxu1 %v2675_v48 }
 0x8f0   : > { %v1655_v49 = vpop.xlane.xlu1 %1654 }
 0x8f1   : > { %v1659_v50 = vmul.f32 0.0078125, %v1655_v49 }
 0x8f2   : > { %v1664_v51 = vpop.xlane.xlu0 %1663 }
 0x8f3   : > { %v1669_v52 = vmul.f32 %v1659_v50, %v1659_v50  ;;  %v1667_v53 = vmul.f32 0.0078125, %v1664_v51  ;;  %v1675_v5 = vsub.f32 %v3342_v28, %v1659_v50  ;;  %v2687_v28 = vld [vmem:[%s3170_s26 + $0x18] sm:$0xff]  }
 0x8f4   : > { %2441 = vmatpush3.bf16.msra.mxu0 %v2687_v28 }
 0x8f5   : > { %v1671_v54 = vsub.f32 %v1667_v53, %v1669_v52  ;;  %2442 = vmatprep.subr.bf16.mxu0 %v2688_v25 }
 0x8f6   : > { %v1657_v57 = vpop.xlane.xlu0 %1656 }
 0x8f7   : > { %v1673_v58 = vmax.f32 %v1671_v54, 0.0  ;;  %v1660_v23 = vmul.f32 0.0078125, %v1657_v57 }
 0x8f8   : > { %2443 = vmatpush3.bf16.msra.mxu0 %v2689_v30 }
 0x8f9   : > { %v1677_v59 = vadd.f32 1e-12, %v1673_v58  ;;  %v1670_v61 = vmul.f32 %v1660_v23, %v1660_v23  ;;  %v1676_v8 = vsub.f32 %v1651_v32, %v1660_v23  ;;  %2444 = vmatprep.subr.bf16.mxu0 %v2690_v13  ;;  %v2692_v32 = vld [vmem:[%s3170_s26 + $0x40] sm:$0xff]  }
 0x8fa   : > { %v1666_v60 = vpop.xlane.xlu0 %1665 }
 0x8fb   : > { %v1668_v0 = vmul.f32 0.0078125, %v1666_v60  ;;  %2710 = vrsqrt.f32 %v1677_v59 }
 0x8fc   : > { %2445 = vmatpush3.bf16.msra.mxu0 %v2691_v31 }
 0x8fd   : > { %v1672_v1 = vsub.f32 %v1668_v0, %v1670_v61  ;;  %2446 = vmatprep.subr.bf16.mxu0 %v2692_v32 }
 0x8ff   : > { %v1674_v2 = vmax.f32 %v1672_v1, 0.0 }
 0x900   : > { %2447 = vmatpush3.bf16.msra.mxu0 %v2693_v33 }
 0x901   : > { %v1678_v4 = vadd.f32 1e-12, %v1674_v2 }
 0x903   : > { %2712 = vrsqrt.f32 %v1678_v4 }
 0x908   : > { %v2711_v34 = vpop.eup %2710 }
 0x909   : > { %v1681_v6 = vmul.f32 %v2711_v34, %v1675_v5 }
 0x90b   : > { %v1689_v11 = vmul.f32 %v2355_v7, %v1681_v6 }
 0x90d   : > { %v3375_v15 = vadd.f32 %v2356_v12, %v1689_v11 }
 0x910   : > { %v2713_v9 = vpop.eup %2712 }
 0x911   : > { %v1682_v10 = vmul.f32 %v2713_v9, %v1676_v8 }
 0x913   : > { %v1690_v14 = vmul.f32 %v2355_v7, %v1682_v10 }
 0x915   : > { %v3377_v16 = vadd.f32 %v2356_v12, %v1690_v14 }
 0x917   : > { %v1699_v17 = vpack.c.bf16 %v3377_v16, %v3375_v15 }
 0x919   : > { %1841 = vmatmul.mubr.bf16.vlgmr.msra.gmra.mxu1 %v1699_v17 }
 0x9d9   : > { %v1842_v29 = vpop.f32.mrf.mxu1 }
 0x9da   : > { %v1843_v38 = vadd.f32 %v1842_v29, %v1721_v36 }
 0x9db   : > { %v1844_v56 = vpop.f32.mrf.mxu1 }
 0x9dc   : > { %v1851_v40 = vmul.f32 %v1843_v38, %v1843_v38  ;;  %v1845_v41 = vadd.f32 %v1844_v56, %v1725_v37 }
 0x9dd   : > { %v1846_v42 = vpop.f32.mrf.mxu1 }
 0x9de   : > { %v1855_v43 = vmul.f32 %v1851_v40, %v1843_v38  ;;  %v1852_v44 = vmul.f32 %v1845_v41, %v1845_v41  ;;  %v1847_v45 = vadd.f32 %v1846_v42, %v1721_v36 }
 0x9df   : > { %v1848_v46 = vpop.f32.mrf.mxu1 }
 0x9e0   : > { %v1859_v47 = vmul.f32 0.044715, %v1855_v43  ;;  %v1856_v39 = vmul.f32 %v1852_v44, %v1845_v41  ;;  %v1853_v48 = vmul.f32 %v1847_v45, %v1847_v45  ;;  %v1849_v49 = vadd.f32 %v1848_v46, %v1725_v37 }
 0x9e2   : > { %v1863_v50 = vadd.f32 %v1859_v47, %v1843_v38  ;;  %v1860_v51 = vmul.f32 0.044715, %v1856_v39  ;;  %v1857_v3 = vmul.f32 %v1853_v48, %v1847_v45  ;;  %v1854_v52 = vmul.f32 %v1849_v49, %v1849_v49 }
 0x9e4   : > { %v1867_v62 = vmul.f32 0.7978846, %v1863_v50  ;;  %v1864_v63 = vadd.f32 %v1860_v51, %v1845_v41  ;;  %v1861_v53 = vmul.f32 0.044715, %v1857_v3  ;;  %v1858_v54 = vmul.f32 %v1854_v52, %v1849_v49  ;;  %v2391_v51 = vld [vmem:[%s741_s12] ss:$0 sm:$0xff] }
 0x9e6   : > { %v1868_v57 = vmul.f32 0.7978846, %v1864_v63  ;;  %v1865_v58 = vadd.f32 %v1861_v53, %v1847_v45  ;;  %v1862_v23 = vmul.f32 0.044715, %v1858_v54  ;;  %2714 = vtanh.f32 %v1867_v62 }
 0x9e8   : > { %2716 = vtanh.f32 %v1868_v57  ;;  %v1869_v59 = vmul.f32 0.7978846, %v1865_v58  ;;  %v1866_v60 = vadd.f32 %v1862_v23, %v1849_v49 }
 0x9ea   : > { %2718 = vtanh.f32 %v1869_v59  ;;  %v1870_v61 = vmul.f32 0.7978846, %v1866_v60 }
 0x9ec   : > { %2720 = vtanh.f32 %v1870_v61 }
 0x9f3   : > { %v2715_v0 = vpop.eup %2714 }
 0x9f4   : > { %v1875_v34 = vadd.f32 1.0, %v2715_v0 }
 0x9f5   : > { %v2717_v1 = vpop.eup %2716 }
 0x9f6   : > { %v1876_v2 = vadd.f32 1.0, %v2717_v1  ;;  %v1879_v10 = vmul.f32 0.5, %v1875_v34 }
 0x9f7   : > { %v2719_v4 = vpop.eup %2718 }
 0x9f8   : > { %v1877_v5 = vadd.f32 1.0, %v2719_v4  ;;  %v1880_v9 = vmul.f32 0.5, %v1876_v2  ;;  %v1883_v18 = vmul.f32 %v1879_v10, %v1843_v38 }
 0x9f9   : > { %v2721_v6 = vpop.eup %2720 }
 0x9fa   : > { %v1881_v7 = vmul.f32 0.5, %v1877_v5  ;;  %v1878_v8 = vadd.f32 1.0, %v2721_v6  ;;  %v1884_v14 = vmul.f32 %v1880_v9, %v1845_v41 }
 0x9fc   : > { %v1882_v11 = vmul.f32 0.5, %v1878_v8  ;;  %v1885_v12 = vmul.f32 %v1881_v7, %v1847_v45 }
 0x9fe   : > { %v1886_v17 = vmul.f32 %v1882_v11, %v1849_v49  ;;  %v1887_v35 = vpack.c.bf16 %v1885_v12, %v1883_v18  ;;  %v2390_v49 = vld [vmem:[%s738_s5] ss:$0 sm:$0xff] }
 0xa00   : > { %v1888_v19 = vpack.c.bf16 %v1886_v17, %v1884_v14 }
 0xa02   : > { %2056 = vmatprep.mubr.bf16.mxu0 %v1888_v19 }
 0xa03   : > { %2057 = vmatmul.mubr.bf16.vlgmr.msra.gmra.mxu0 %v1887_v35 }
 0xac3   : > { %v2448_v20 = vpop.f32.mrf.mxu0 }
 0xac5   : > { %v2449_v22 = vpop.f32.mrf.mxu0 }
 0xac6   : > { %v2450_v24 = vadd.f32 %v2449_v22, %v2448_v20 }
 0xac7   : > { %v2451_v26 = vpop.f32.mrf.mxu0 }
 0xac8   : > { %v2059_v27 = vadd.f32 %v2450_v24, %v2373_v21 }
 0xac9   : > { %v2452_v28 = vpop.f32.mrf.mxu0 }
 0xaca   : > { %v2453_v25 = vadd.f32 %v2452_v28, %v2451_v26  ;;  %v2065_v30 = vadd.f32 %v2059_v27, %v3375_v15 }
 0xacc   : > { %v2062_v13 = vadd.f32 %v2453_v25, %v2373_v21  ;;  %2069 = vadd.xlane.f32.xlu1 %v2065_v30  ;;  %v2075_v32 = vmul.f32 %v2065_v30, %v2065_v30 }
 0xace   : > { %v2066_v31 = vadd.f32 %v2062_v13, %v3377_v16 }
 0xad0   : > { %2071 = vadd.xlane.f32.xlu0 %v2066_v31  ;;  %2077 = vadd.xlane.f32.xlu1 %v2075_v32  ;;  %v2076_v33 = vmul.f32 %v2066_v31, %v2066_v31 }
 0xad4   : > { %2079 = vadd.xlane.f32.xlu0 %v2076_v33 }
 0xb55   : > { %v2070_v55 = vpop.xlane.xlu1 %2069 }
 0xb56   : > { %v2073_v36 = vmul.f32 0.0078125, %v2070_v55 }
 0xb58   : > { %v2083_v38 = vmul.f32 %v2073_v36, %v2073_v36  ;;  %v2089_v39 = vsub.f32 %v2065_v30, %v2073_v36 }
 0xb59   : > { %v2072_v37 = vpop.xlane.xlu0 %2071  ;;  %v2078_v29 = vpop.xlane.xlu1 %2077 }
 0xb5a   : > { %v2074_v56 = vmul.f32 0.0078125, %v2072_v37  ;;  %v2081_v40 = vmul.f32 0.0078125, %v2078_v29 }
 0xb5c   : > { %v2085_v41 = vsub.f32 %v2081_v40, %v2083_v38  ;;  %v2084_v42 = vmul.f32 %v2074_v56, %v2074_v56  ;;  %v2090_v3 = vsub.f32 %v2066_v31, %v2074_v56 }
 0xb5d   : > { %v2080_v15 = vpop.xlane.xlu0 %2079 }
 0xb5e   : > { %v2087_v43 = vmax.f32 %v2085_v41, 0.0  ;;  %v2082_v44 = vmul.f32 0.0078125, %v2080_v15 }
 0xb60   : > { %v2091_v16 = vadd.f32 1e-12, %v2087_v43  ;;  %v2086_v45 = vsub.f32 %v2082_v44, %v2084_v42 }
 0xb62   : > { %2722 = vrsqrt.f32 %v2091_v16  ;;  %v2088_v46 = vmax.f32 %v2086_v45, 0.0 }
 0xb64   : > { %v2092_v47 = vadd.f32 1e-12, %v2088_v46 }
 0xb66   : > { %2724 = vrsqrt.f32 %v2092_v47 }
 0xb6f   : > { %v2723_v48 = vpop.eup %2722 }
 0xb70   : > { %v2095_v50 = vmul.f32 %v2723_v48, %v2089_v39 }
 0xb72   : > { %v2103_v52 = vmul.f32 %v2390_v49, %v2095_v50 }
 0xb73   : > { %v2725_v62 = vpop.eup %2724 }
 0xb74   : > { %v2111_v63 = vadd.f32 %v2391_v51, %v2103_v52  ;;  %v2096_v53 = vmul.f32 %v2725_v62, %v2090_v3 }
 0xb76   : > { %2113 = vst [vmem:[#allocation2] sm:$0xff] %v2111_v63  ;;  %v2104_v54 = vmul.f32 %v2390_v49, %v2096_v53  ;;  %2118 = sbr.rel (%p2392_p5) target bundleno = 2947 (0xb83), region = 104 }
 0xb78   : > { %v2112_v57 = vadd.f32 %v2391_v51, %v2104_v54 }
 0xb7a   : > { %2114 = vst [vmem:[#allocation2 + $0x8] sm:$0xff] %v2112_v57 }
 0xb81   : > { %v2119_v58 = vld [vmem:[#allocation2] ss:$8 sm:$0x3] }
 0xb82   : > { %2120 = vst [vmem:[%s3499_s10] sm:$0x3] %v2119_v58 }
 0xb83 PF: > { %s3500_s24 = sld [smem:[#allocation11_spill]]  ;;  %s3503_s21 = smov %s2840_s22 }
 0xb84   : > { %s3501_s12 = sld [smem:[#allocation10_spill]] }
 0xb85   : > { %s3502_s23 = sld [smem:[#allocation12_spill]] }
 0xb89   : > { %p29_p6 = scmp.ge.s32.totalorder %s3500_s24, 4  }
 0xb8a   : > { %s3504_s22 = smov %s3501_s12 }
 0xb8b   :  { %31 = sbr.rel (!%p29_p6) target bundleno = 18 (0x12), region = 179 }
 0xb90   :  { %2132 = vsyncpa [#allocation4], 1 }
 0xb91   :  { %2134 = vsyncpa [#allocation4 + $0x1], 1 }
 0xb92   :  { %2135 = vsyncpa [#allocation6], 1 }
 0xb93   :  { %2137 = vsyncpa [#allocation6 + $0x1], 1 }

</bundles_post_ra>
